<compile_context>
chip_gen: v5e
topology: v5e:2x2
jax: 0.10.0
libtpu: 0.0.40
codegen_flags: <defaults>
</compile_context>

<pallas_src>
import numpy as np
import jax
import jax.numpy as jnp
from jax import lax
from jax.experimental import pallas as pl
from jax.experimental.pallas import tpu as pltpu


# -----------------------------------------------------------------------------
# Kernel
# -----------------------------------------------------------------------------
def _decoder_kernel(feats_ref, wemb_ref,
                    wh0_ref, bh0_ref, wc0_ref, bc0_ref,
                    wf_ref, bf_ref, wha_ref, bha_ref, we_ref, be_ref,
                    wihz_ref, wihw_ref, whh_ref, bg_ref,
                    wlh_ref, blh_ref, wlz_ref, blz_ref, wlo_ref, blo_ref,
                    out_ref, attn_ref):
    feats = feats_ref[...]                              # (Bp, S, Ep)
    Bp, S, Ep = feats.shape
    Hp = whh_ref.shape[0]
    T = wemb_ref.shape[0]

    # ---- h0 / c0 from mean-pooled features (computed once) ----
    mean_f = jnp.mean(feats, axis=1)                    # (Bp, Ep)
    h0 = jnp.tanh(jnp.dot(mean_f, wh0_ref[...],
                          preferred_element_type=jnp.float32) + bh0_ref[...])
    c0 = jnp.tanh(jnp.dot(mean_f, wc0_ref[...],
                          preferred_element_type=jnp.float32) + bc0_ref[...])

    # ---- Loop-invariant attention projection Lf(features): hoisted out of T loop ----
    lf = (jnp.dot(feats.reshape(Bp * S, Ep), wf_ref[...],
                  preferred_element_type=jnp.float32)
          .reshape(Bp, S, -1) + bf_ref[...])            # (Bp, S, Ap)

    # Hoist weight loads out of the loop (they are VMEM-resident anyway).
    wha = wha_ref[...]; bha = bha_ref[...]; we = we_ref[...]; be = be_ref[...]
    wihz = wihz_ref[...]; wihw = wihw_ref[...]; whh = whh_ref[...]; bg = bg_ref[...]
    wlh = wlh_ref[...]; blh = blh_ref[...]; wlz = wlz_ref[...]; blz = blz_ref[...]
    wlo = wlo_ref[...]; blo = blo_ref[...]

    def step(t, carry):
        h, c = carry                                    # (Bp, Hp), (Bp, Hp)

        # ---- Attention: e = Le(tanh(Lf(feats) + Lh(h))), softmax over S, context z ----
        lh = jnp.dot(h, wha, preferred_element_type=jnp.float32) + bha       # (Bp, Ap)
        tv = jnp.tanh(lf + lh[:, None, :])                                   # (Bp, S, Ap)
        e = jnp.sum(tv * we, axis=-1) + be                                   # (Bp, S)
        e = e - jnp.max(e, axis=1, keepdims=True)
        ex = jnp.exp(e)
        denom = jnp.sum(ex, axis=1, keepdims=True)                           # (Bp, 1)
        inv = pl.reciprocal(denom, approx=True)                              # EUP slot
        inv = inv * (2.0 - denom * inv)                                      # 1 Newton step -> ~f32 exact
        attn = ex * inv                                                      # (Bp, S)
        z = jnp.sum(attn[:, :, None] * feats, axis=1)                        # (Bp, Ep)

        # ---- LSTMCell on (z, wemb): split-weight matmuls, 128-lane-aligned gates ----
        wemb = wemb_ref[t]                                                   # (Bp, Wdp)
        gates = (jnp.dot(z, wihz, preferred_element_type=jnp.float32)
                 + jnp.dot(wemb, wihw, preferred_element_type=jnp.float32)
                 + jnp.dot(h, whh, preferred_element_type=jnp.float32)
                 + bg)                                                       # (Bp, 4*Hp)
        i_g = jax.nn.sigmoid(gates[:, 0 * Hp:1 * Hp])
        f_g = jax.nn.sigmoid(gates[:, 1 * Hp:2 * Hp])
        g_g = jnp.tanh(gates[:, 2 * Hp:3 * Hp])
        o_g = jax.nn.sigmoid(gates[:, 3 * Hp:4 * Hp])
        c_new = f_g * c + i_g * g_g
        h_new = o_g * jnp.tanh(c_new)

        # ---- Output projection: Lo(wemb + Lh(dropout(h)) + Lz(z)) ----
        # TODO(synk): dropout(p=0.5) treated as identity (eval-mode semantics).
        pre = (wemb
               + jnp.dot(h_new, wlh, preferred_element_type=jnp.float32) + blh
               + jnp.dot(z, wlz, preferred_element_type=jnp.float32) + blz)  # (Bp, Wdp)
        logits = jnp.dot(pre, wlo, preferred_element_type=jnp.float32) + blo # (Bp, Vp)

        out_ref[t] = logits          # full-tile store on the major (untiled) axis
        attn_ref[t] = attn
        return (h_new, c_new)

    lax.fori_loop(0, T, step, (h0, c0))


# -----------------------------------------------------------------------------
# Wrapper: padding / per-gate layout / pallas_call
# -----------------------------------------------------------------------------
def _round_up(x, m):
    return ((x + m - 1) // m) * m


def _pad_to(x, shape):
    return jnp.pad(x, [(0, s - d) for d, s in zip(x.shape, shape)])


def _pad_gate_blocks(w, rows_p, H, Hp):
    """(rows, 4H) PyTorch-gate-ordered (i,f,g,o) weights -> (rows_p, 4*Hp) with each
    H-wide gate block placed at a 128-lane-aligned column offset k*Hp, zeros elsewhere."""
    blocks = [_pad_to(w[:, k * H:(k + 1) * H], (rows_p, Hp)) for k in range(4)]
    return jnp.concatenate(blocks, axis=1)


def lstm_forward(params, inputs, answers):
    """Teacher-forcing forward. inputs: (B,S,E) f32, answers: (B,T) int32.
    Returns (outputs (B,T,V), attns (B,T,S)) matching the PyTorch module."""
    inputs = jnp.asarray(inputs, jnp.float32)
    B, S, E = inputs.shape
    T = int(answers.shape[1])
    Wd = params["emb"].shape[1]
    V = params["wlo"].shape[1]
    H = params["whh"].shape[0]
    A = params["wf"].shape[1]

    Bp = _round_up(B, 8)                                 # sublane alignment
    Ep, Hp, Ap, Wdp, Vp = (_round_up(d, 128) for d in (E, H, A, Wd, V))  # lane alignment

    # Glue (runs once in XLA, outside the kernel): embedding gather + zero padding.
    feats = _pad_to(inputs, (Bp, S, Ep))
    wemb_seq = _pad_to(jnp.take(params["emb"], answers.T, axis=0), (T, Bp, Wdp))

    wh0 = _pad_to(params["wh0"], (Ep, Hp)); bh0 = _pad_to(params["bh0"], (1, Hp))
    wc0 = _pad_to(params["wc0"], (Ep, Hp)); bc0 = _pad_to(params["bc0"], (1, Hp))
    wf = _pad_to(params["wf"], (Ep, Ap));   bf = _pad_to(params["bf"], (1, Ap))
    wha = _pad_to(params["wha"], (Hp, Ap)); bha = _pad_to(params["bha"], (1, Ap))
    we = _pad_to(params["we"], (1, Ap));    be = params["be"]                 # (1, 1)

    # LSTMCell weights: split rows (z-part / wemb-part), combine biases, per-gate pad.
    wihz = _pad_gate_blocks(params["wih"][:E], Ep, H, Hp)
    wihw = _pad_gate_blocks(params["wih"][E:], Wdp, H, Hp)
    whh = _pad_gate_blocks(params["whh"], Hp, H, Hp)
    bg = _pad_gate_blocks(params["bih"] + params["bhh"], 1, H, Hp)

    wlh = _pad_to(params["wlh"], (Hp, Wdp)); blh = _pad_to(params["blh"], (1, Wdp))
    wlz = _pad_to(params["wlz"], (Ep, Wdp)); blz = _pad_to(params["blz"], (1, Wdp))
    wlo = _pad_to(params["wlo"], (Wdp, Vp)); blo = _pad_to(params["blo"], (1, Vp))

    args = (feats, wemb_seq, wh0, bh0, wc0, bc0, wf, bf, wha, bha, we, be,
            wihz, wihw, whh, bg, wlh, blh, wlz, blz, wlo, blo)

    vmem = pl.BlockSpec(memory_space=pltpu.MemorySpace.VMEM)   # whole array, VMEM-resident
    outs, attns = pl.pallas_call(
        _decoder_kernel,
        out_shape=(jax.ShapeDtypeStruct((T, Bp, Vp), jnp.float32),
                   jax.ShapeDtypeStruct((T, Bp, S), jnp.float32)),
        in_specs=[vmem] * len(args),
        out_specs=(vmem, vmem),
    )(*args)

    # torch cats along dim=1 -> (B, T, V) / (B, T, S); transpose fuses with the padding slice.
    return outs.transpose(1, 0, 2)[:B, :, :V], attns.transpose(1, 0, 2)[:B, :, :]

# TODO(synk): the answers=None greedy-decode path (argmax feedback into the embedding
# lookup) is data-dependent across steps and is not implemented here.


# -----------------------------------------------------------------------------
# Pure-JAX reference (mirrors the PyTorch forward, teacher forcing, eval dropout)
# -----------------------------------------------------------------------------
def lstm_forward_ref(params, inputs, answers):
    B, S, E = inputs.shape
    T = answers.shape[1]
    H = params["whh"].shape[0]
    mean_f = inputs.mean(axis=1)
    h = jnp.tanh(mean_f @ params["wh0"] + params["bh0"])
    c = jnp.tanh(mean_f @ params["wc0"] + params["bc0"])
    outs, attns = [], []
    for i in range(T):
        lf = jnp.einsum('bse,ea->bsa', inputs, params["wf"]) + params["bf"]
        lh = h @ params["wha"] + params["bha"]
        tv = jnp.tanh(lf + lh[:, None, :])
        e = jnp.sum(tv * params["we"], axis=-1) + params["be"]
        attn = jax.nn.softmax(e, axis=1)
        z = jnp.sum(attn[:, :, None] * inputs, axis=1)
        wemb = params["emb"][answers[:, i]]
        x = jnp.concatenate([z, wemb], axis=1)
        gates = x @ params["wih"] + params["bih"] + h @ params["whh"] + params["bhh"]
        i_g = jax.nn.sigmoid(gates[:, :H])
        f_g = jax.nn.sigmoid(gates[:, H:2 * H])
        g_g = jnp.tanh(gates[:, 2 * H:3 * H])
        o_g = jax.nn.sigmoid(gates[:, 3 * H:])
        c = f_g * c + i_g * g_g
        h = o_g * jnp.tanh(c)
        pre = wemb + (h @ params["wlh"] + params["blh"]) + (z @ params["wlz"] + params["blz"])
        outs.append(pre @ params["wlo"] + params["blo"])
        attns.append(attn)
    return jnp.stack(outs, axis=1), jnp.stack(attns, axis=1)


def init_params(key, E, Wd, H, A, V):
    ks = jax.random.split(key, 16)

    def linear(k, fin, fout):
        k1, k2 = jax.random.split(k)
        bound = 1.0 / np.sqrt(fin)
        w = jax.random.uniform(k1, (fin, fout), jnp.float32, -bound, bound)
        b = jax.random.uniform(k2, (1, fout), jnp.float32, -bound, bound)
        return w, b

    p = {}
    p["wh0"], p["bh0"] = linear(ks[0], E, H)        # layer_h0
    p["wc0"], p["bc0"] = linear(ks[1], E, H)        # layer_c0
    p["wf"], p["bf"] = linear(ks[2], E, A)          # Attention.Lf
    p["wha"], p["bha"] = linear(ks[3], H, A)        # Attention.Lh
    we, be = linear(ks[4], A, 1)                    # Attention.Le
    p["we"] = we.T                                  # (1, A)
    p["be"] = be                                    # (1, 1)
    bound = 1.0 / np.sqrt(H)                        # LSTMCell(E+Wd, H), gates i,f,g,o
    p["wih"] = jax.random.uniform(ks[5], (E + Wd, 4 * H), jnp.float32, -bound, bound)
    p["bih"] = jax.random.uniform(ks[6], (1, 4 * H), jnp.float32, -bound, bound)
    p["whh"] = jax.random.uniform(ks[7], (H, 4 * H), jnp.float32, -bound, bound)
    p["bhh"] = jax.random.uniform(ks[8], (1, 4 * H), jnp.float32, -bound, bound)
    p["wlo"], p["blo"] = linear(ks[9], Wd, V)       # Lo
    p["wlh"], p["blh"] = linear(ks[10], H, Wd)      # Lh
    p["wlz"], p["blz"] = linear(ks[11], E, Wd)      # Lz
    p["emb"] = jax.random.normal(ks[12], (V, Wd), jnp.float32)  # word_embedding
    return p


if __name__ == "__main__":
    B, S, E, Wd, H, A, V, T = 4, 8, 32, 16, 32, 16, 40, 6
    key = jax.random.PRNGKey(0)
    kp, kx, ka = jax.random.split(key, 3)

    params = init_params(kp, E, Wd, H, A, V)
    inputs = jax.random.normal(kx, (B, S, E), jnp.float32)       # encoder features
    answers = jax.random.randint(ka, (B, T), 0, V, dtype=jnp.int32)

    outputs, attns = jax.jit(lstm_forward)(params, inputs, answers)
    outputs = jax.block_until_ready(outputs)
    attns = jax.block_until_ready(attns)

    ref_out, ref_attn = lstm_forward_ref(params, inputs, answers)
    assert outputs.shape == (B, T, V) and attns.shape == (B, T, S)
    np.testing.assert_allclose(np.asarray(outputs), np.asarray(ref_out), rtol=2e-3, atol=2e-3)
    np.testing.assert_allclose(np.asarray(attns), np.asarray(ref_attn), rtol=2e-3, atol=2e-3)

    print("KERNEL_OK")
</pallas_src>

<mosaic_0001>
module attributes {stable_mosaic.version = 11 : i64} {
  func.func @_decoder_kernel(%arg0: memref<8x8x128xf32, #tpu.memory_space<vmem>>, %arg1: memref<6x8x128xf32, #tpu.memory_space<vmem>>, %arg2: memref<128x128xf32, #tpu.memory_space<vmem>>, %arg3: memref<1x128xf32, #tpu.memory_space<vmem>>, %arg4: memref<128x128xf32, #tpu.memory_space<vmem>>, %arg5: memref<1x128xf32, #tpu.memory_space<vmem>>, %arg6: memref<128x128xf32, #tpu.memory_space<vmem>>, %arg7: memref<1x128xf32, #tpu.memory_space<vmem>>, %arg8: memref<128x128xf32, #tpu.memory_space<vmem>>, %arg9: memref<1x128xf32, #tpu.memory_space<vmem>>, %arg10: memref<1x128xf32, #tpu.memory_space<vmem>>, %arg11: memref<1x1xf32, #tpu.memory_space<vmem>>, %arg12: memref<128x512xf32, #tpu.memory_space<vmem>>, %arg13: memref<128x512xf32, #tpu.memory_space<vmem>>, %arg14: memref<128x512xf32, #tpu.memory_space<vmem>>, %arg15: memref<1x512xf32, #tpu.memory_space<vmem>>, %arg16: memref<128x128xf32, #tpu.memory_space<vmem>>, %arg17: memref<1x128xf32, #tpu.memory_space<vmem>>, %arg18: memref<128x128xf32, #tpu.memory_space<vmem>>, %arg19: memref<1x128xf32, #tpu.memory_space<vmem>>, %arg20: memref<128x128xf32, #tpu.memory_space<vmem>>, %arg21: memref<1x128xf32, #tpu.memory_space<vmem>>, %arg22: memref<6x8x128xf32, #tpu.memory_space<vmem>>, %arg23: memref<6x8x8xf32, #tpu.memory_space<vmem>>) attributes {dimension_semantics = [], scalar_prefetch = 0 : i64, scratch_operands = 0 : i64, tpu.core_type = #tpu.core_type<tc>} {
    %c0 = arith.constant 0 : index
    %c0_0 = arith.constant 0 : index
    %c0_1 = arith.constant 0 : index
    %0 = vector.load %arg0[%c0, %c0_0, %c0_1] : memref<8x8x128xf32, #tpu.memory_space<vmem>>, vector<8x8x128xf32>
    %cst = arith.constant dense<0.000000e+00> : vector<8x128xf32>
    %1 = vector.multi_reduction <add>, %0, %cst [1] : vector<8x8x128xf32> to vector<8x128xf32>
    %cst_2 = arith.constant 8.000000e+00 : f32
    %2 = vector.broadcast %cst_2 : f32 to vector<8x128xf32>
    %3 = arith.divf %1, %2 : vector<8x128xf32>
    %c0_3 = arith.constant 0 : index
    %c0_4 = arith.constant 0 : index
    %4 = vector.load %arg2[%c0_3, %c0_4] : memref<128x128xf32, #tpu.memory_space<vmem>>, vector<128x128xf32>
    %cst_5 = arith.constant dense<0.000000e+00> : vector<8x128xf32>
    %5 = tpu.matmul %3, %4, %cst_5 {dimension_numbers = #tpu.dot_dimension_numbers<[1], [0], [0], [1], [0, 0, 1, 1], [], []>} : vector<8x128xf32>, vector<128x128xf32>, vector<8x128xf32> -> vector<8x128xf32>
    %c0_6 = arith.constant 0 : index
    %c0_7 = arith.constant 0 : index
    %6 = vector.load %arg3[%c0_6, %c0_7] : memref<1x128xf32, #tpu.memory_space<vmem>>, vector<1x128xf32>
    %7 = vector.broadcast %6 : vector<1x128xf32> to vector<8x128xf32>
    %8 = arith.addf %5, %7 : vector<8x128xf32>
    %9 = math.tanh %8 : vector<8x128xf32>
    %c0_8 = arith.constant 0 : index
    %c0_9 = arith.constant 0 : index
    %10 = vector.load %arg4[%c0_8, %c0_9] : memref<128x128xf32, #tpu.memory_space<vmem>>, vector<128x128xf32>
    %cst_10 = arith.constant dense<0.000000e+00> : vector<8x128xf32>
    %11 = tpu.matmul %3, %10, %cst_10 {dimension_numbers = #tpu.dot_dimension_numbers<[1], [0], [0], [1], [0, 0, 1, 1], [], []>} : vector<8x128xf32>, vector<128x128xf32>, vector<8x128xf32> -> vector<8x128xf32>
    %c0_11 = arith.constant 0 : index
    %c0_12 = arith.constant 0 : index
    %12 = vector.load %arg5[%c0_11, %c0_12] : memref<1x128xf32, #tpu.memory_space<vmem>>, vector<1x128xf32>
    %13 = vector.broadcast %12 : vector<1x128xf32> to vector<8x128xf32>
    %14 = arith.addf %11, %13 : vector<8x128xf32>
    %15 = math.tanh %14 : vector<8x128xf32>
    %16 = vector.shape_cast %0 : vector<8x8x128xf32> to vector<64x128xf32>
    %c0_13 = arith.constant 0 : index
    %c0_14 = arith.constant 0 : index
    %17 = vector.load %arg6[%c0_13, %c0_14] : memref<128x128xf32, #tpu.memory_space<vmem>>, vector<128x128xf32>
    %cst_15 = arith.constant dense<0.000000e+00> : vector<64x128xf32>
    %18 = tpu.matmul %16, %17, %cst_15 {dimension_numbers = #tpu.dot_dimension_numbers<[1], [0], [0], [1], [0, 0, 1, 1], [], []>} : vector<64x128xf32>, vector<128x128xf32>, vector<64x128xf32> -> vector<64x128xf32>
    %19 = vector.shape_cast %18 : vector<64x128xf32> to vector<8x8x128xf32>
    %c0_16 = arith.constant 0 : index
    %c0_17 = arith.constant 0 : index
    %20 = vector.load %arg7[%c0_16, %c0_17] : memref<1x128xf32, #tpu.memory_space<vmem>>, vector<1x128xf32>
    %21 = vector.shape_cast %20 : vector<1x128xf32> to vector<1x1x128xf32>
    %22 = vector.broadcast %21 : vector<1x1x128xf32> to vector<8x8x128xf32>
    %23 = arith.addf %19, %22 : vector<8x8x128xf32>
    %c0_18 = arith.constant 0 : index
    %c0_19 = arith.constant 0 : index
    %24 = vector.load %arg8[%c0_18, %c0_19] : memref<128x128xf32, #tpu.memory_space<vmem>>, vector<128x128xf32>
    %c0_20 = arith.constant 0 : index
    %c0_21 = arith.constant 0 : index
    %25 = vector.load %arg9[%c0_20, %c0_21] : memref<1x128xf32, #tpu.memory_space<vmem>>, vector<1x128xf32>
    %c0_22 = arith.constant 0 : index
    %c0_23 = arith.constant 0 : index
    %26 = vector.load %arg10[%c0_22, %c0_23] : memref<1x128xf32, #tpu.memory_space<vmem>>, vector<1x128xf32>
    %c0_24 = arith.constant 0 : index
    %c0_25 = arith.constant 0 : index
    %27 = vector.load %arg11[%c0_24, %c0_25] : memref<1x1xf32, #tpu.memory_space<vmem>>, vector<1x1xf32>
    %c0_26 = arith.constant 0 : index
    %c0_27 = arith.constant 0 : index
    %28 = vector.load %arg12[%c0_26, %c0_27] : memref<128x512xf32, #tpu.memory_space<vmem>>, vector<128x512xf32>
    %c0_28 = arith.constant 0 : index
    %c0_29 = arith.constant 0 : index
    %29 = vector.load %arg13[%c0_28, %c0_29] : memref<128x512xf32, #tpu.memory_space<vmem>>, vector<128x512xf32>
    %c0_30 = arith.constant 0 : index
    %c0_31 = arith.constant 0 : index
    %30 = vector.load %arg14[%c0_30, %c0_31] : memref<128x512xf32, #tpu.memory_space<vmem>>, vector<128x512xf32>
    %c0_32 = arith.constant 0 : index
    %c0_33 = arith.constant 0 : index
    %31 = vector.load %arg15[%c0_32, %c0_33] : memref<1x512xf32, #tpu.memory_space<vmem>>, vector<1x512xf32>
    %c0_34 = arith.constant 0 : index
    %c0_35 = arith.constant 0 : index
    %32 = vector.load %arg16[%c0_34, %c0_35] : memref<128x128xf32, #tpu.memory_space<vmem>>, vector<128x128xf32>
    %c0_36 = arith.constant 0 : index
    %c0_37 = arith.constant 0 : index
    %33 = vector.load %arg17[%c0_36, %c0_37] : memref<1x128xf32, #tpu.memory_space<vmem>>, vector<1x128xf32>
    %c0_38 = arith.constant 0 : index
    %c0_39 = arith.constant 0 : index
    %34 = vector.load %arg18[%c0_38, %c0_39] : memref<128x128xf32, #tpu.memory_space<vmem>>, vector<128x128xf32>
    %c0_40 = arith.constant 0 : index
    %c0_41 = arith.constant 0 : index
    %35 = vector.load %arg19[%c0_40, %c0_41] : memref<1x128xf32, #tpu.memory_space<vmem>>, vector<1x128xf32>
    %c0_42 = arith.constant 0 : index
    %c0_43 = arith.constant 0 : index
    %36 = vector.load %arg20[%c0_42, %c0_43] : memref<128x128xf32, #tpu.memory_space<vmem>>, vector<128x128xf32>
    %c0_44 = arith.constant 0 : index
    %c0_45 = arith.constant 0 : index
    %37 = vector.load %arg21[%c0_44, %c0_45] : memref<1x128xf32, #tpu.memory_space<vmem>>, vector<1x128xf32>
    %c0_i32 = arith.constant 0 : i32
    %c6_i32 = arith.constant 6 : i32
    %38 = arith.addi %c0_i32, %c6_i32 : i32
    %c1_i32 = arith.constant 1 : i32
    %39:2 = scf.for %arg24 = %c0_i32 to %38 step %c1_i32 iter_args(%arg25 = %9, %arg26 = %15) -> (vector<8x128xf32>, vector<8x128xf32>)  : i32 {
      %cst_47 = arith.constant dense<0.000000e+00> : vector<8x128xf32>
      %40 = tpu.matmul %arg25, %24, %cst_47 {dimension_numbers = #tpu.dot_dimension_numbers<[1], [0], [0], [1], [0, 0, 1, 1], [], []>} : vector<8x128xf32>, vector<128x128xf32>, vector<8x128xf32> -> vector<8x128xf32>
      %41 = vector.broadcast %25 : vector<1x128xf32> to vector<8x128xf32>
      %42 = arith.addf %40, %41 : vector<8x128xf32>
      %43 = vector.shape_cast %42 : vector<8x128xf32> to vector<8x1x128xf32>
      %44 = vector.broadcast %43 : vector<8x1x128xf32> to vector<8x8x128xf32>
      %45 = arith.addf %23, %44 : vector<8x8x128xf32>
      %46 = math.tanh %45 : vector<8x8x128xf32>
      %47 = vector.shape_cast %26 : vector<1x128xf32> to vector<1x1x128xf32>
      %48 = vector.broadcast %47 : vector<1x1x128xf32> to vector<8x8x128xf32>
      %49 = arith.mulf %46, %48 : vector<8x8x128xf32>
      %cst_48 = arith.constant dense<0.000000e+00> : vector<8x8xf32>
      %50 = vector.multi_reduction <add>, %49, %cst_48 [2] : vector<8x8x128xf32> to vector<8x8xf32>
      %51 = vector.broadcast %27 : vector<1x1xf32> to vector<8x8xf32>
      %52 = arith.addf %50, %51 : vector<8x8xf32>
      %cst_49 = arith.constant dense<0xFF800000> : vector<8xf32>
      %53 = vector.multi_reduction <maximumf>, %52, %cst_49 [1] : vector<8x8xf32> to vector<8xf32>
      %54 = vector.shape_cast %53 : vector<8xf32> to vector<8x1xf32>
      %55 = vector.broadcast %54 : vector<8x1xf32> to vector<8x8xf32>
      %56 = arith.subf %52, %55 : vector<8x8xf32>
      %57 = math.exp %56 : vector<8x8xf32>
      %cst_50 = arith.constant dense<0.000000e+00> : vector<8xf32>
      %58 = vector.multi_reduction <add>, %57, %cst_50 [1] : vector<8x8xf32> to vector<8xf32>
      %59 = vector.shape_cast %58 : vector<8xf32> to vector<8x1xf32>
      %60 = tpu.reciprocal %59 {approx = true} : vector<8x1xf32> -> vector<8x1xf32>
      %61 = arith.mulf %59, %60 : vector<8x1xf32>
      %cst_51 = arith.constant 2.000000e+00 : f32
      %62 = vector.broadcast %cst_51 : f32 to vector<8x1xf32>
      %63 = arith.subf %62, %61 : vector<8x1xf32>
      %64 = arith.mulf %60, %63 : vector<8x1xf32>
      %65 = vector.broadcast %64 : vector<8x1xf32> to vector<8x8xf32>
      %66 = arith.mulf %57, %65 : vector<8x8xf32>
      %67 = vector.shape_cast %66 : vector<8x8xf32> to vector<8x8x1xf32>
      %68 = vector.broadcast %67 : vector<8x8x1xf32> to vector<8x8x128xf32>
      %69 = arith.mulf %68, %0 : vector<8x8x128xf32>
      %cst_52 = arith.constant dense<0.000000e+00> : vector<8x128xf32>
      %70 = vector.multi_reduction <add>, %69, %cst_52 [1] : vector<8x8x128xf32> to vector<8x128xf32>
      %71 = arith.index_cast %arg24 : i32 to index
      %c0_53 = arith.constant 0 : index
      %c0_54 = arith.constant 0 : index
      %72 = vector.load %arg1[%71, %c0_53, %c0_54] : memref<6x8x128xf32, #tpu.memory_space<vmem>>, vector<1x8x128xf32>
      %73 = vector.shape_cast %72 : vector<1x8x128xf32> to vector<8x128xf32>
      %cst_55 = arith.constant dense<0.000000e+00> : vector<8x512xf32>
      %74 = tpu.matmul %70, %28, %cst_55 {dimension_numbers = #tpu.dot_dimension_numbers<[1], [0], [0], [1], [0, 0, 1, 1], [], []>} : vector<8x128xf32>, vector<128x512xf32>, vector<8x512xf32> -> vector<8x512xf32>
      %cst_56 = arith.constant dense<0.000000e+00> : vector<8x512xf32>
      %75 = tpu.matmul %73, %29, %cst_56 {dimension_numbers = #tpu.dot_dimension_numbers<[1], [0], [0], [1], [0, 0, 1, 1], [], []>} : vector<8x128xf32>, vector<128x512xf32>, vector<8x512xf32> -> vector<8x512xf32>
      %76 = arith.addf %74, %75 : vector<8x512xf32>
      %cst_57 = arith.constant dense<0.000000e+00> : vector<8x512xf32>
      %77 = tpu.matmul %arg25, %30, %cst_57 {dimension_numbers = #tpu.dot_dimension_numbers<[1], [0], [0], [1], [0, 0, 1, 1], [], []>} : vector<8x128xf32>, vector<128x512xf32>, vector<8x512xf32> -> vector<8x512xf32>
      %78 = arith.addf %76, %77 : vector<8x512xf32>
      %79 = vector.broadcast %31 : vector<1x512xf32> to vector<8x512xf32>
      %80 = arith.addf %78, %79 : vector<8x512xf32>
      %81 = vector.extract_strided_slice %80 {offsets = [0, 0], sizes = [8, 128], strides = [1, 1]} : vector<8x512xf32> to vector<8x128xf32>
      %82 = arith.negf %81 : vector<8x128xf32>
      %83 = math.exp %82 : vector<8x128xf32>
      %cst_58 = arith.constant 1.000000e+00 : f32
      %84 = vector.broadcast %cst_58 : f32 to vector<8x128xf32>
      %85 = arith.addf %84, %83 : vector<8x128xf32>
      %86 = arith.divf %84, %85 : vector<8x128xf32>
      %87 = vector.extract_strided_slice %80 {offsets = [0, 128], sizes = [8, 128], strides = [1, 1]} : vector<8x512xf32> to vector<8x128xf32>
      %88 = arith.negf %87 : vector<8x128xf32>
      %89 = math.exp %88 : vector<8x128xf32>
      %cst_59 = arith.constant 1.000000e+00 : f32
      %90 = vector.broadcast %cst_59 : f32 to vector<8x128xf32>
      %91 = arith.addf %90, %89 : vector<8x128xf32>
      %92 = arith.divf %90, %91 : vector<8x128xf32>
      %93 = vector.extract_strided_slice %80 {offsets = [0, 256], sizes = [8, 128], strides = [1, 1]} : vector<8x512xf32> to vector<8x128xf32>
      %94 = math.tanh %93 : vector<8x128xf32>
      %95 = vector.extract_strided_slice %80 {offsets = [0, 384], sizes = [8, 128], strides = [1, 1]} : vector<8x512xf32> to vector<8x128xf32>
      %96 = arith.negf %95 : vector<8x128xf32>
      %97 = math.exp %96 : vector<8x128xf32>
      %cst_60 = arith.constant 1.000000e+00 : f32
      %98 = vector.broadcast %cst_60 : f32 to vector<8x128xf32>
      %99 = arith.addf %98, %97 : vector<8x128xf32>
      %100 = arith.divf %98, %99 : vector<8x128xf32>
      %101 = arith.mulf %92, %arg26 : vector<8x128xf32>
      %102 = arith.mulf %86, %94 : vector<8x128xf32>
      %103 = arith.addf %101, %102 : vector<8x128xf32>
      %104 = math.tanh %103 : vector<8x128xf32>
      %105 = arith.mulf %100, %104 : vector<8x128xf32>
      %cst_61 = arith.constant dense<0.000000e+00> : vector<8x128xf32>
      %106 = tpu.matmul %105, %32, %cst_61 {dimension_numbers = #tpu.dot_dimension_numbers<[1], [0], [0], [1], [0, 0, 1, 1], [], []>} : vector<8x128xf32>, vector<128x128xf32>, vector<8x128xf32> -> vector<8x128xf32>
      %107 = arith.addf %73, %106 : vector<8x128xf32>
      %108 = vector.broadcast %33 : vector<1x128xf32> to vector<8x128xf32>
      %109 = arith.addf %107, %108 : vector<8x128xf32>
      %cst_62 = arith.constant dense<0.000000e+00> : vector<8x128xf32>
      %110 = tpu.matmul %70, %34, %cst_62 {dimension_numbers = #tpu.dot_dimension_numbers<[1], [0], [0], [1], [0, 0, 1, 1], [], []>} : vector<8x128xf32>, vector<128x128xf32>, vector<8x128xf32> -> vector<8x128xf32>
      %111 = arith.addf %109, %110 : vector<8x128xf32>
      %112 = vector.broadcast %35 : vector<1x128xf32> to vector<8x128xf32>
      %113 = arith.addf %111, %112 : vector<8x128xf32>
      %cst_63 = arith.constant dense<0.000000e+00> : vector<8x128xf32>
      %114 = tpu.matmul %113, %36, %cst_63 {dimension_numbers = #tpu.dot_dimension_numbers<[1], [0], [0], [1], [0, 0, 1, 1], [], []>} : vector<8x128xf32>, vector<128x128xf32>, vector<8x128xf32> -> vector<8x128xf32>
      %115 = vector.broadcast %37 : vector<1x128xf32> to vector<8x128xf32>
      %116 = arith.addf %114, %115 : vector<8x128xf32>
      %117 = arith.index_cast %arg24 : i32 to index
      %c0_64 = arith.constant 0 : index
      %c0_65 = arith.constant 0 : index
      %118 = vector.load %arg22[%117, %c0_64, %c0_65] : memref<6x8x128xf32, #tpu.memory_space<vmem>>, vector<1x8x128xf32>
      %119 = vector.shape_cast %118 : vector<1x8x128xf32> to vector<8x128xf32>
      %120 = vector.shape_cast %116 : vector<8x128xf32> to vector<1x8x128xf32>
      tpu.vector_store %arg22[%117, %c0_64, %c0_65], %120 {strides = array<i32>} : memref<6x8x128xf32, #tpu.memory_space<vmem>>, vector<1x8x128xf32>,
      %121 = arith.index_cast %arg24 : i32 to index
      %c0_66 = arith.constant 0 : index
      %c0_67 = arith.constant 0 : index
      %122 = vector.load %arg23[%121, %c0_66, %c0_67] : memref<6x8x8xf32, #tpu.memory_space<vmem>>, vector<1x8x8xf32>
      %123 = vector.shape_cast %122 : vector<1x8x8xf32> to vector<8x8xf32>
      %124 = vector.shape_cast %66 : vector<8x8xf32> to vector<1x8x8xf32>
      tpu.vector_store %arg23[%121, %c0_66, %c0_67], %124 {strides = array<i32>} : memref<6x8x8xf32, #tpu.memory_space<vmem>>, vector<1x8x8xf32>,
      scf.yield %105, %103 : vector<8x128xf32>, vector<8x128xf32>
    }
    %c6_i32_46 = arith.constant 6 : i32
    return
  }
}

</mosaic_0001>

<bundles_post_ra>
// kernel: lstm_forward.1
= control target key start
LH: loop header
LB: loop body
LE: loop exit
PB: predicated region body
PF: predicated region fallthrough
CT: control target
= control target key end

     0   :  { %v1531_v2 = vmov 8.0   ;;  %vm174_vm1 = vcmask 1041409   ;;  %vm176_vm2 = vcmask 1042434   ;;  %vm178_vm3 = vcmask 1043459   ;;  %s3656_s6 = inlined_call_operand.vmem [shape: f32[128,128], index: 6, kind: input, shape index: {}]   ;;  %s3657_s1 = inlined_call_operand.vmem [shape: f32[6,8,128], index: 1, kind: input, shape index: {}]   ;;  %s3658_s11 = inlined_call_operand.<no memory space> [shape: f32[1,1], index: 11, kind: input, shape index: {}]   ;;  %s3659_s22 = inlined_call_operand.vmem [shape: f32[6,8,128], index: 22, kind: output, shape index: {0}]   ;;  %s3660_s23 = inlined_call_operand.vmem [shape: f32[6,8,8], index: 23, kind: output, shape index: {1}]   ;;  %s3661_s0 = inlined_call_operand.vmem [shape: f32[8,8,128], index: 0, kind: input, shape index: {}]   ;;  %s3662_s2 = inlined_call_operand.vmem [shape: f32[128,128], index: 2, kind: input, shape index: {}]   ;;  %s3663_s4 = inlined_call_operand.vmem [shape: f32[128,128], index: 4, kind: input, shape index: {}]   ;;  %s3664_s7 = inlined_call_operand.vmem [shape: f32[1,128], index: 7, kind: input, shape index: {}]   ;;  %s3665_s3 = inlined_call_operand.vmem [shape: f32[1,128], index: 3, kind: input, shape index: {}]   ;;  %s3666_s5 = inlined_call_operand.vmem [shape: f32[1,128], index: 5, kind: input, shape index: {}]   ;;  %s3667_s8 = inlined_call_operand.vmem [shape: f32[128,128], index: 8, kind: input, shape index: {}]   ;;  %s3668_s9 = inlined_call_operand.vmem [shape: f32[1,128], index: 9, kind: input, shape index: {}]   ;;  %s3669_s10 = inlined_call_operand.vmem [shape: f32[1,128], index: 10, kind: input, shape index: {}]   ;;  %s3670_s12 = inlined_call_operand.vmem [shape: f32[128,512], index: 12, kind: input, shape index: {}]   ;;  %s3671_s13 = inlined_call_operand.vmem [shape: f32[128,512], index: 13, kind: input, shape index: {}]   ;;  %s3672_s14 = inlined_call_operand.vmem [shape: f32[128,512], index: 14, kind: input, shape index: {}]   ;;  %s3673_s15 = inlined_call_operand.vmem [shape: f32[1,512], index: 15, kind: input, shape index: {}]   ;;  %s3674_s16 = inlined_call_operand.vmem [shape: f32[128,128], index: 16, kind: input, shape index: {}]   ;;  %s3675_s17 = inlined_call_operand.vmem [shape: f32[1,128], index: 17, kind: input, shape index: {}]   ;;  %s3676_s18 = inlined_call_operand.vmem [shape: f32[128,128], index: 18, kind: input, shape index: {}]   ;;  %s3677_s19 = inlined_call_operand.vmem [shape: f32[1,128], index: 19, kind: input, shape index: {}]   ;;  %s3678_s20 = inlined_call_operand.vmem [shape: f32[128,128], index: 20, kind: input, shape index: {}]   ;;  %s3679_s21 = inlined_call_operand.vmem [shape: f32[1,128], index: 21, kind: input, shape index: {}]  }
   0x1   :  { %3693 = sst [smem:[#allocation253_spill]] %s3656_s6  ;;  %1448 = vrcp.f32 %v1531_v2  ;;  %vm180_vm4 = vcmask 1044484   ;;  %vm182_vm5 = vcmask 1045509   ;;  %vm184_vm6 = vcmask 1046534  }
   0x2   :  { %3694 = sst [smem:[#allocation254_spill]] %s3657_s1  ;;  %vm186_vm7 = vcmask 1047559  }
   0x3   :  { %3695 = sst [smem:[#allocation255_spill]] %s3658_s11 }
   0x4   :  { %3696 = sst [smem:[#allocation256_spill]] %s3659_s22 }
   0x5   :  { %3697 = sst [smem:[#allocation257_spill]] %s3660_s23 }
   0x6   :  { %3698 = sst [smem:[#allocation258_spill]] %s3661_s0 }
   0x7   :  { %3699 = sst [smem:[#allocation259_spill]] %s3662_s2  ;;  %v1676_v8 = vpop.eup %1448 }
   0x8   :  { %3700 = sst [smem:[#allocation260_spill]] %s3663_s4  ;;  %v132_v13 = vmul.f32 8.0, %v1676_v8  ;;  %vm136_vm0 = vweird.f32 %v1676_v8 }
   0x9   :  { %s3701_s24 = sld [smem:[#allocation253_spill]] }
   0xa   :  { %s3702_s26 = sld [smem:[#allocation255_spill]]  ;;  %v133_v23 = vsub.f32 1.0, %v132_v13 }
   0xb   :  { %s3703_s6 = sld [smem:[#allocation258_spill]] }
   0xc   :  { %s3705_s25 = sld [smem:[#allocation259_spill]]  ;;  %v134_v38 = vmul.f32 %v1676_v8, %v133_v23 }
   0xd   :  { %s3706_s11 = sld [smem:[#allocation260_spill]] }
   0xe   :  { %v135_v56 = vadd.f32 %v1676_v8, %v134_v38 }
   0xf   :  { %v266_v0 = vld [vmem:[%s3701_s24 + $0x78] sm:$0xff]  ;;  %v265_v1 = vld [vmem:[%s3701_s24 + $0x70] sm:$0xff]  ;;  %v264_v4 = vld [vmem:[%s3701_s24 + $0x68] sm:$0xff] }
  0x10   :  { %v29_v3 = vstv %s3702_s26  ;;  %1403 = vmatpush.msra.mxu3 %v266_v0  ;;  %267 = vmatpush.msra.mxu2 %v266_v0  ;;  %v263_v5 = vld [vmem:[%s3701_s24 + $0x60] sm:$0xff]  ;;  %v262_v9 = vld [vmem:[%s3701_s24 + $0x58] sm:$0xff]  ;;  %v261_v16 = vld [vmem:[%s3701_s24 + $0x50] sm:$0xff] }
  0x11   :  { %30 = vst [vmem:[#allocation2] sm:$0x1] %v29_v3  ;;  %v1671_v6 = vld [vmem:[%s3703_s6 + $0x18] sm:$0xff]  ;;  %v1695_v15 = vld [vmem:[%s3703_s6 + $0x20] sm:$0xff]  ;;  %v260_v22 = vld [vmem:[%s3701_s24 + $0x48] sm:$0xff] }
  0x12   :  { %1404 = vmatpush.msra.mxu3 %v265_v1  ;;  %268 = vmatpush.msra.mxu2 %v265_v1  ;;  %3704 = vst [vmem:[#allocation3_spill] sm:$0xff] %v1671_v6  ;;  %v161_v7 = vld [vmem:[%s3705_s25 + $0x78] sm:$0xff]  ;;  %v101_v10 = vrot.slane %v1671_v6, 4  ;;  %v160_v12 = vld [vmem:[%s3705_s25 + $0x70] sm:$0xff]  ;;  %v107_v18 = vrot.slane %v1695_v15, 4  ;;  %v159_v19 = vld [vmem:[%s3705_s25 + $0x68] sm:$0xff] }
  0x13   :  { %189 = vmatpush.msra.mxu0 %v161_v7  ;;  %v225_v11 = vld [vmem:[%s3706_s11 + $0x78] sm:$0xff]  ;;  %v224_v14 = vld [vmem:[%s3706_s11 + $0x70] sm:$0xff]  ;;  %3707 = vst [vmem:[#allocation4_spill] sm:$0xff] %v1695_v15  ;;  %v223_v20 = vld [vmem:[%s3706_s11 + $0x68] sm:$0xff] }
  0x14   :  { %1405 = vmatpush.msra.mxu3 %v264_v4  ;;  %269 = vmatpush.msra.mxu2 %v264_v4  ;;  %v102_v17 = vadd.f32 %v101_v10, %v1671_v6  ;;  %v158_v21 = vld [vmem:[%s3705_s25 + $0x60] sm:$0xff]  ;;  %v108_v24 = vadd.f32 %v107_v18, %v1695_v15  ;;  %v157_v27 = vld [vmem:[%s3705_s25 + $0x58] sm:$0xff]  ;;  %v1730_v29 = vld [vmem:[%s3703_s6 + $0x28] sm:$0xff] }
  0x15   :  { %230 = vmatpush.msra.mxu1 %v225_v11  ;;  %190 = vmatpush.msra.mxu0 %v160_v12  ;;  %v1718_v25 = vld [vmem:[%s3703_s6] sm:$0xff]  ;;  %3709 = vst [vmem:[#allocation6_spill] sm:$0xff] %v1730_v29  ;;  %v113_v33 = vrot.slane %v1730_v29, 4  ;;  %v221_v34 = vld [vmem:[%s3706_s11 + $0x58] sm:$0xff]  ;;  %v156_v35 = vld [vmem:[%s3705_s25 + $0x50] sm:$0xff] }
  0x16   :  { %1406 = vmatpush.msra.mxu3 %v263_v5  ;;  %270 = vmatpush.msra.mxu2 %v263_v5  ;;  %3708 = vst [vmem:[#allocation5_spill] sm:$0xff] %v1718_v25  ;;  %v222_v26 = vld [vmem:[%s3706_s11 + $0x60] sm:$0xff]  ;;  %v83_v28 = vrot.slane %v1718_v25, 4  ;;  %v103_v31 = vrot.slane %v102_v17, 2  ;;  %v109_v32 = vrot.slane %v108_v24, 2  ;;  %v258_v37 = vld [vmem:[%s3701_s24 + $0x38] sm:$0xff] }
  0x17   :  { %231 = vmatpush.msra.mxu1 %v224_v14  ;;  %191 = vmatpush.msra.mxu0 %v159_v19  ;;  %v259_v30 = vld [vmem:[%s3701_s24 + $0x40] sm:$0xff]  ;;  %v114_v39 = vadd.f32 %v113_v33, %v1730_v29  ;;  %v1751_v40 = vld [vmem:[%s3703_s6 + $0x8] sm:$0xff]  ;;  %v220_v41 = vld [vmem:[%s3706_s11 + $0x50] sm:$0xff]  ;;  %v1815_v14 = vsel %vm136_vm0, %v1676_v8, %v135_v56 }
  0x18   :  { %1407 = vmatpush.msra.mxu3 %v262_v9  ;;  %271 = vmatpush.msra.mxu2 %v262_v9  ;;  %v84_v36 = vadd.f32 %v83_v28, %v1718_v25  ;;  %3710 = vst [vmem:[#allocation7_spill] sm:$0xff] %v1751_v40  ;;  %v89_v43 = vrot.slane %v1751_v40, 4  ;;  %v1760_v44 = vld [vmem:[%s3703_s6 + $0x10] sm:$0xff]  ;;  %v104_v46 = vadd.f32 %v103_v31, %v102_v17  ;;  %v155_v49 = vld [vmem:[%s3705_s25 + $0x48] sm:$0xff]  ;;  %v154_v53 = vld [vmem:[%s3705_s25 + $0x40] sm:$0xff] }
  0x19   :  { %232 = vmatpush.msra.mxu1 %v223_v20  ;;  %192 = vmatpush.msra.mxu0 %v158_v21  ;;  %3711 = vst [vmem:[#allocation8_spill] sm:$0xff] %v1760_v44  ;;  %v257_v45 = vld [vmem:[%s3701_s24 + $0x30] sm:$0xff]  ;;  %v110_v47 = vadd.f32 %v109_v32, %v108_v24  ;;  %v115_v48 = vrot.slane %v114_v39, 2  ;;  %v95_v50 = vrot.slane %v1760_v44, 4  ;;  %v219_v52 = vld [vmem:[%s3706_s11 + $0x48] sm:$0xff]  ;;  %v218_v60 = vld [vmem:[%s3706_s11 + $0x40] sm:$0xff] }
  0x1a   :  { %1408 = vmatpush.msra.mxu3 %v261_v16  ;;  %272 = vmatpush.msra.mxu2 %v261_v16  ;;  %v85_v42 = vrot.slane %v84_v36, 2  ;;  %v90_v54 = vadd.f32 %v89_v43, %v1751_v40  ;;  %v256_v55 = vld [vmem:[%s3701_s24 + $0x28] sm:$0xff]  ;;  %v1784_v58 = vld [vmem:[%s3703_s6 + $0x30] sm:$0xff]  ;;  %v153_v61 = vld [vmem:[%s3705_s25 + $0x38] sm:$0xff]  ;;  %v105_v2 = vrot.slane %v104_v46, 1 }
  0x1b   :  { %233 = vmatpush.msra.mxu1 %v222_v26  ;;  %193 = vmatpush.msra.mxu0 %v157_v27  ;;  %v116_v57 = vadd.f32 %v115_v48, %v114_v39  ;;  %3712 = vst [vmem:[#allocation9_spill] sm:$0xff] %v1784_v58  ;;  %v119_v63 = vrot.slane %v1784_v58, 4  ;;  %v96_v0 = vadd.f32 %v95_v50, %v1760_v44  ;;  %v255_v1 = vld [vmem:[%s3701_s24 + $0x20] sm:$0xff]  ;;  %v111_v3 = vrot.slane %v110_v47, 1  ;;  %v1800_v4 = vld [vmem:[%s3703_s6 + $0x38] sm:$0xff]  ;;  %v152_v9 = vld [vmem:[%s3705_s25 + $0x30] sm:$0xff] }
  0x1c   :  { %1409 = vmatpush.msra.mxu3 %v260_v22  ;;  %273 = vmatpush.msra.mxu2 %v260_v22  ;;  %v86_v51 = vadd.f32 %v85_v42, %v84_v36  ;;  %v91_v62 = vrot.slane %v90_v54, 2  ;;  %3713 = vst [vmem:[#allocation10_spill] sm:$0xff] %v1800_v4  ;;  %v217_v7 = vld [vmem:[%s3706_s11 + $0x38] sm:$0xff]  ;;  %v125_v16 = vrot.slane %v1800_v4, 4  ;;  %v216_v18 = vld [vmem:[%s3706_s11 + $0x30] sm:$0xff]  ;;  %v106_v8 = vadd.f32 %v105_v2, %v104_v46  ;;  %v151_v24 = vld [vmem:[%s3705_s25 + $0x28] sm:$0xff] }
  0x1d   :  { %234 = vmatpush.msra.mxu1 %v221_v34  ;;  %194 = vmatpush.msra.mxu0 %v156_v35  ;;  %v120_v11 = vadd.f32 %v119_v63, %v1784_v58  ;;  %v97_v12 = vrot.slane %v96_v0, 2  ;;  %v254_v13 = vld [vmem:[%s3701_s24 + $0x18] sm:$0xff]  ;;  %v117_v17 = vrot.slane %v116_v57, 1  ;;  %v253_v22 = vld [vmem:[%s3701_s24 + $0x10] sm:$0xff]  ;;  %v112_v23 = vadd.f32 %v111_v3, %v110_v47  ;;  %v215_v31 = vld [vmem:[%s3706_s11 + $0x28] sm:$0xff] }
  0x1e   :  { %1410 = vmatpush.msra.mxu3 %v259_v30  ;;  %274 = vmatpush.msra.mxu2 %v259_v30  ;;  %v87_v59 = vrot.slane %v86_v51, 1  ;;  %v92_v10 = vadd.f32 %v91_v62, %v90_v54  ;;  %v126_v26 = vadd.f32 %v125_v16, %v1800_v4  ;;  %v150_v32 = vld [vmem:[%s3705_s25 + $0x20] sm:$0xff]  ;;  %v252_v34 = vld [vmem:[%s3701_s24 + $0x8] sm:$0xff]  ;;  %v212_v56 = vld [vmem:[%s3706_s11 + $0x10] sm:$0xff] }
  0x1f   :  { %235 = vmatpush.msra.mxu1 %v220_v41  ;;  %195 = vmatpush.msra.mxu0 %v155_v49  ;;  %v121_v20 = vrot.slane %v120_v11, 2  ;;  %v98_v21 = vadd.f32 %v97_v12, %v96_v0  ;;  %v118_v36 = vadd.f32 %v117_v17, %v116_v57  ;;  %v214_v39 = vld [vmem:[%s3706_s11 + $0x20] sm:$0xff]  ;;  %v149_v41 = vld [vmem:[%s3705_s25 + $0x18] sm:$0xff]  ;;  %v142_v46 = vmul.f32 %v1815_v14, %v112_v23  ;;  %v147_v57 = vld [vmem:[%s3705_s25 + $0x8] sm:$0xff] }
  0x20   :  { %1411 = vmatpush.msra.mxu3 %v258_v37  ;;  %275 = vmatpush.msra.mxu2 %v258_v37  ;;  %v88_v5 = vadd.f32 %v87_v59, %v86_v51  ;;  %v93_v19 = vrot.slane %v92_v10, 1  ;;  %v127_v35 = vrot.slane %v126_v26, 2  ;;  %v251_v43 = vld [vmem:[%s3701_s24] sm:$0xff]  ;;  %v213_v51 = vld [vmem:[%s3706_s11 + $0x18] sm:$0xff]  ;;  %v211_v63 = vld [vmem:[%s3706_s11 + $0x8] sm:$0xff] }
  0x21   :  { %236 = vmatpush.msra.mxu1 %v219_v52  ;;  %196 = vmatpush.msra.mxu0 %v154_v53  ;;  %v122_v30 = vadd.f32 %v121_v20, %v120_v11  ;;  %v99_v33 = vrot.slane %v98_v21, 1  ;;  %v148_v52 = vld [vmem:[%s3705_s25 + $0x10] sm:$0xff]  ;;  %v143_v54 = vmul.f32 %v1815_v14, %v118_v36  ;;  %v146_v0 = vld [vmem:[%s3705_s25] sm:$0xff]  ;;  %v1935_v23 = vld [vmem:[%s3667_s8 + $0x28] sm:$0xff] }
  0x22   :  { %1412 = vmatpush.msra.mxu3 %v257_v45  ;;  %276 = vmatpush.msra.mxu2 %v257_v45  ;;  %v138_v27 = vmul.f32 %v1815_v14, %v88_v5  ;;  %v94_v28 = vadd.f32 %v93_v19, %v92_v10  ;;  %v141_v45 = vmul.f32 %v1815_v14, %v106_v8  ;;  %v210_v5 = vld [vmem:[%s3706_s11] sm:$0xff]  ;;  %v1915_v19 = vld [vmem:[%s3667_s8 + $0x8] sm:$0xff]  ;;  %v1920_v20 = vld [vmem:[%s3667_s8 + $0x10] sm:$0xff] }
  0x23   :  { %237 = vmatpush.msra.mxu1 %v218_v60  ;;  %197 = vmatpush.msra.mxu0 %v153_v61  ;;  %v123_v38 = vrot.slane %v122_v30, 1  ;;  %v100_v42 = vadd.f32 %v99_v33, %v98_v21  ;;  %v128_v47 = vadd.f32 %v127_v35, %v126_v26  ;;  %v1446_v10 = vld [vmem:[%s3665_s3] ss:$0 sm:$0xff]  ;;  %3717 = vst [vmem:[#allocation14_spill] sm:$0xff] %v1915_v19  ;;  %v1940_v26 = vld [vmem:[%s3667_s8 + $0x30] sm:$0xff]  ;;  %v1965_v33 = vld [vmem:[%s3667_s8 + $0x58] sm:$0xff] }
  0x24   :  { %1413 = vmatpush.msra.mxu3 %v256_v55  ;;  %277 = vmatpush.msra.mxu2 %v256_v55  ;;  %v139_v37 = vmul.f32 %v1815_v14, %v94_v28  ;;  %3718 = vst [vmem:[#allocation15_spill] sm:$0xff] %v1920_v20  ;;  %v1930_v8 = vld [vmem:[%s3667_s8 + $0x20] sm:$0xff]  ;;  %v1975_v35 = vld [vmem:[%s3667_s8 + $0x68] sm:$0xff]  ;;  %v1980_v36 = vld [vmem:[%s3667_s8 + $0x70] sm:$0xff] }
  0x25   :  { %238 = vmatpush.msra.mxu1 %v217_v7  ;;  %198 = vmatpush.msra.mxu0 %v152_v9  ;;  %v124_v48 = vadd.f32 %v123_v38, %v122_v30  ;;  %v140_v49 = vmul.f32 %v1815_v14, %v100_v42  ;;  %v129_v53 = vrot.slane %v128_v47, 1  ;;  %v1893_v9 = vld [vmem:[%s3664_s7] ss:$0 sm:$0xff]  ;;  %3720 = vst [vmem:[#allocation17_spill] sm:$0xff] %v1930_v8 }
  0x26   :  { %1414 = vmatpush.msra.mxu3 %v255_v1  ;;  %278 = vmatpush.msra.mxu2 %v255_v1  ;;  %v175_v50 = vsel %vm174_vm1, %v139_v37, %v138_v27  ;;  %3721 = vst [vmem:[#allocation18_spill] sm:$0xff] %v1935_v23  ;;  %v1945_v27 = vld [vmem:[%s3667_s8 + $0x38] sm:$0xff]  ;;  %v1950_v28 = vld [vmem:[%s3667_s8 + $0x40] sm:$0xff] }
  0x27   :  { %239 = vmatpush.msra.mxu1 %v216_v18  ;;  %199 = vmatpush.msra.mxu0 %v151_v24  ;;  %v177_v55 = vsel %vm176_vm2, %v140_v49, %v175_v50  ;;  %v130_v59 = vadd.f32 %v129_v53, %v128_v47  ;;  %v144_v60 = vmul.f32 %v1815_v14, %v124_v48  ;;  %v1910_v18 = vld [vmem:[%s3667_s8] sm:$0xff]  ;;  %v1985_v37 = vld [vmem:[%s3667_s8 + $0x78] sm:$0xff]  ;;  %v2012_v47 = vld [vmem:[%s3670_s12 + $0x10] sm:$0xff] }
  0x28   :  { %1415 = vmatpush.msra.mxu3 %v254_v13  ;;  %279 = vmatpush.msra.mxu2 %v254_v13  ;;  %v179_v61 = vsel %vm178_vm3, %v141_v45, %v177_v55  ;;  %v1447_v13 = vld [vmem:[%s3666_s5] ss:$0 sm:$0xff]  ;;  %3716 = vst [vmem:[#allocation13_spill] sm:$0xff] %v1910_v18  ;;  %v2017_v48 = vld [vmem:[%s3670_s12 + $0x18] sm:$0xff]  ;;  %v2038_v53 = vld [vmem:[%s3670_s12 + $0x30] sm:$0xff] }
  0x29   :  { %240 = vmatpush.msra.mxu1 %v215_v31  ;;  %200 = vmatpush.msra.mxu0 %v150_v32  ;;  %v181_v62 = vsel %vm180_vm4, %v142_v46, %v179_v61  ;;  %v145_v1 = vmul.f32 %v1815_v14, %v130_v59  ;;  %3722 = vst [vmem:[#allocation19_spill] sm:$0xff] %v1940_v26  ;;  %v1955_v31 = vld [vmem:[%s3667_s8 + $0x48] sm:$0xff]  ;;  %v1960_v32 = vld [vmem:[%s3667_s8 + $0x50] sm:$0xff]  ;;  %v1990_v38 = vld [vmem:[%s3668_s9] sm:$0x1] }
  0x2a   :  { %1416 = vmatpush.msra.mxu3 %v253_v22  ;;  %280 = vmatpush.msra.mxu2 %v253_v22  ;;  %v183_v2 = vsel %vm182_vm5, %v143_v54, %v181_v62  ;;  %v1925_v22 = vld [vmem:[%s3667_s8 + $0x18] sm:$0xff]  ;;  %3723 = vst [vmem:[#allocation20_spill] sm:$0xff] %v1945_v27  ;;  %v2002_v42 = vld [vmem:[%s3670_s12] sm:$0xff]  ;;  %v2060_v59 = vld [vmem:[%s3670_s12 + $0x50] sm:$0xff] }
  0x2b   :  { %241 = vmatpush.msra.mxu1 %v214_v39  ;;  %201 = vmatpush.msra.mxu0 %v149_v41  ;;  %v185_v3 = vsel %vm184_vm6, %v144_v60, %v183_v2  ;;  %3719 = vst [vmem:[#allocation16_spill] sm:$0xff] %v1925_v22  ;;  %v1995_v39 = vld [vmem:[%s3669_s10] sm:$0x1]  ;;  %v2043_v54 = vld [vmem:[%s3670_s12 + $0x38] sm:$0xff]  ;;  %v2075_v62 = vld [vmem:[%s3670_s12 + $0x68] sm:$0xff]  ;;  %s3247_s10 = smov 0  }
  0x2c   :  { %1417 = vmatpush.msra.mxu3 %v252_v34  ;;  %281 = vmatpush.msra.mxu2 %v252_v34  ;;  %v187_v7 = vsel %vm186_vm7, %v145_v1, %v185_v3  ;;  %3724 = vst [vmem:[#allocation21_spill] sm:$0xff] %v1950_v28  ;;  %v1970_v34 = vld [vmem:[%s3667_s8 + $0x60] sm:$0xff]  ;;  %v2065_v60 = vld [vmem:[%s3670_s12 + $0x58] sm:$0xff]  ;;  %v2097_v3 = vld [vmem:[%s3670_s12 + $0x88] sm:$0xff] }
  0x2d   :  { %242 = vmatpush.msra.mxu1 %v213_v51  ;;  %202 = vmatpush.msra.mxu0 %v148_v52  ;;  %3725 = vst [vmem:[#allocation22_spill] sm:$0xff] %v1955_v31  ;;  %v1997_v41 = vld [vmem:[#allocation2] sm:$0x1]  ;;  %v2033_v52 = vld [vmem:[%s3670_s12 + $0x28] sm:$0xff]  ;;  %v2087_v1 = vld [vmem:[%s3670_s12 + $0x78] sm:$0xff] }
  0x2e   :  { %1418 = vmatpush.msra.mxu3 %v251_v43  ;;  %282 = vmatpush.msra.mxu2 %v251_v43  ;;  %3726 = vst [vmem:[#allocation23_spill] sm:$0xff] %v1960_v32  ;;  %v2007_v43 = vld [vmem:[%s3670_s12 + $0x8] sm:$0xff]  ;;  %v2022_v49 = vld [vmem:[%s3670_s12 + $0x20] sm:$0xff]  ;;  %v2659_v18 = vld [vmem:[%s3671_s13 + $0x1f8] sm:$0xff] }
  0x2f   :  { %292 = vmatmul.f32.vlgmr.msra.gmra.mxu3 %v1671_v6  ;;  %283 = vmatmul.f32.vlgmr.msra.gmra.mxu2 %v1718_v25  ;;  %3727 = vst [vmem:[#allocation24_spill] sm:$0xff] %v1965_v33  ;;  %v2070_v61 = vld [vmem:[%s3670_s12 + $0x60] sm:$0xff]  ;;  %v2173_v6 = vld [vmem:[%s3670_s12 + $0xf8] sm:$0xff] }
  0x30   :  { %243 = vmatpush.msra.mxu1 %v212_v56  ;;  %203 = vmatpush.msra.mxu0 %v147_v57  ;;  %3728 = vst [vmem:[#allocation25_spill] sm:$0xff] %v1990_v38  ;;  %v2050_v56 = vld [vmem:[%s3670_s12 + $0x40] sm:$0xff]  ;;  %v2055_v57 = vld [vmem:[%s3670_s12 + $0x48] sm:$0xff]  ;;  %v2193_v25 = vld [vmem:[%s3670_s12 + $0x118] sm:$0xff] }
  0x31   :  { %3729 = vst [vmem:[#allocation26_spill] sm:$0xff] %v1995_v39  ;;  %v2092_v2 = vld [vmem:[%s3670_s12 + $0x80] sm:$0xff]  ;;  %v2213_v39 = vld [vmem:[%s3670_s12 + $0x138] sm:$0xff] }
  0x32   :  { %244 = vmatpush.msra.mxu1 %v211_v63  ;;  %204 = vmatpush.msra.mxu0 %v146_v0  ;;  %3730 = vst [vmem:[#allocation27_spill] sm:$0xff] %v1997_v41  ;;  %v2082_v0 = vld [vmem:[%s3670_s12 + $0x70] sm:$0xff]  ;;  %v2198_v41 = vld [vmem:[%s3670_s12 + $0x120] sm:$0xff] }
  0x33   :  { %205 = vmatmul.f32.vlgmr.msra.gmra.mxu0 %v187_v7  ;;  %3731 = vst [vmem:[#allocation28_spill] sm:$0xff] %v2002_v42  ;;  %v2238_v38 = vld [vmem:[%s3670_s12 + $0x160] sm:$0xff]  ;;  %v2316_v42 = vld [vmem:[%s3670_s12 + $0x1d8] sm:$0xff] }
  0x34   :  { %245 = vmatpush.msra.mxu1 %v210_v5  ;;  %3732 = vst [vmem:[#allocation29_spill] sm:$0xff] %v2007_v43  ;;  %v2102_v5 = vld [vmem:[%s3670_s12 + $0x90] sm:$0xff]  ;;  %v2346_v43 = vld [vmem:[%s3671_s13 + $0x8] sm:$0xff] }
  0x35   :  { %246 = vmatmul.f32.vlgmr.msra.gmra.mxu1 %v187_v7  ;;  %3733 = vst [vmem:[#allocation30_spill] sm:$0xff] %v2012_v47  ;;  %v2107_v7 = vld [vmem:[%s3670_s12 + $0x98] sm:$0xff]  ;;  %v2311_v47 = vld [vmem:[%s3670_s12 + $0x1d0] sm:$0xff] }
  0x36   :  { %3734 = vst [vmem:[#allocation31_spill] sm:$0xff] %v2017_v48  ;;  %v2243_v48 = vld [vmem:[%s3670_s12 + $0x168] sm:$0xff] }
  0x37   :  { %295 = vmatmul.f32.gmra.mxu3 %v1695_v15  ;;  %286 = vmatmul.f32.gmra.mxu2 %v1751_v40  ;;  %3735 = vst [vmem:[#allocation32_spill] sm:$0xff] %v2022_v49  ;;  %v2188_v40 = vld [vmem:[%s3670_s12 + $0x110] sm:$0xff] }
  0x38   :  { %3738 = vst [vmem:[#allocation35_spill] sm:$0xff] %v2033_v52  ;;  %v2331_v49 = vld [vmem:[%s3670_s12 + $0x1f0] sm:$0xff]  ;;  %v2366_v52 = vld [vmem:[%s3671_s13 + $0x28] sm:$0xff] }
  0x39   :  { %3739 = vst [vmem:[#allocation36_spill] sm:$0xff] %v2038_v53  ;;  %v2326_v53 = vld [vmem:[%s3670_s12 + $0x1e8] sm:$0xff] }
  0x3a   :  { %3740 = vst [vmem:[#allocation37_spill] sm:$0xff] %v2043_v54  ;;  %v2248_v54 = vld [vmem:[%s3670_s12 + $0x170] sm:$0xff] }
  0x3b   :  { %3741 = vst [vmem:[#allocation38_spill] sm:$0xff] %v2050_v56  ;;  %v2351_v56 = vld [vmem:[%s3671_s13 + $0x10] sm:$0xff] }
  0x3c   :  { %3742 = vst [vmem:[#allocation39_spill] sm:$0xff] %v2055_v57  ;;  %v2386_v57 = vld [vmem:[%s3671_s13 + $0x48] sm:$0xff] }
  0x3d   :  { %3743 = vst [vmem:[#allocation40_spill] sm:$0xff] %v2060_v59  ;;  %v2336_v59 = vld [vmem:[%s3670_s12 + $0x1f8] sm:$0xff] }
  0x3e   :  { %3744 = vst [vmem:[#allocation41_spill] sm:$0xff] %v2065_v60  ;;  %v2253_v60 = vld [vmem:[%s3670_s12 + $0x178] sm:$0xff] }
  0x3f   :  { %298 = vmatmul.f32.gmra.mxu3 %v1730_v29  ;;  %289 = vmatmul.f32.gmra.mxu2 %v1760_v44  ;;  %3745 = vst [vmem:[#allocation42_spill] sm:$0xff] %v2070_v61  ;;  %v2163_v29 = vld [vmem:[%s3670_s12 + $0xe8] sm:$0xff]  ;;  %v2168_v44 = vld [vmem:[%s3670_s12 + $0xf0] sm:$0xff] }
  0x40   :  { %3746 = vst [vmem:[#allocation43_spill] sm:$0xff] %v2075_v62  ;;  %v2371_v61 = vld [vmem:[%s3671_s13 + $0x30] sm:$0xff]  ;;  %v2401_v62 = vld [vmem:[%s3671_s13 + $0x60] sm:$0xff] }
  0x41   :  { %3747 = vst [vmem:[#allocation44_spill] sm:$0xff] %v2082_v0  ;;  %v2356_v0 = vld [vmem:[%s3671_s13 + $0x18] sm:$0xff] }
  0x42   :  { %3748 = vst [vmem:[#allocation45_spill] sm:$0xff] %v2087_v1  ;;  %v2258_v1 = vld [vmem:[%s3670_s12 + $0x180] sm:$0xff] }
  0x43   :  { %3749 = vst [vmem:[#allocation46_spill] sm:$0xff] %v2092_v2 }
  0x44   :  { %3750 = vst [vmem:[#allocation47_spill] sm:$0xff] %v2097_v3  ;;  %v2414_v3 = vld [vmem:[%s3671_s13 + $0x70] sm:$0xff] }
  0x45   :  { %3751 = vst [vmem:[#allocation48_spill] sm:$0xff] %v2102_v5  ;;  %v2376_v5 = vld [vmem:[%s3671_s13 + $0x38] sm:$0xff] }
  0x46   :  { %3752 = vst [vmem:[#allocation49_spill] sm:$0xff] %v2107_v7  ;;  %v2263_v7 = vld [vmem:[%s3670_s12 + $0x188] sm:$0xff] }
  0x47   :  { %301 = vmatmul.f32.gmra.mxu3 %v1784_v58  ;;  %v2152_v58 = vld [vmem:[%s3670_s12 + $0xe0] sm:$0xff]  ;;  %3764 = vst [vmem:[#allocation61_spill] sm:$0xff] %v2163_v29  ;;  %v2494_v29 = vld [vmem:[%s3671_s13 + $0xf0] sm:$0xff] }
  0x48   :  { %3761 = vst [vmem:[#allocation58_spill] sm:$0xff] %v2152_v58  ;;  %v2459_v58 = vld [vmem:[%s3671_s13 + $0xb8] sm:$0xff] }
  0x49   :  { %3765 = vst [vmem:[#allocation62_spill] sm:$0xff] %v2168_v44  ;;  %v2449_v44 = vld [vmem:[%s3671_s13 + $0xa8] sm:$0xff] }
  0x4a   :  { %3766 = vst [vmem:[#allocation63_spill] sm:$0xff] %v2173_v6  ;;  %v2273_v6 = vld [vmem:[%s3670_s12 + $0x198] sm:$0xff] }
  0x4b   :  { %3769 = vst [vmem:[#allocation66_spill] sm:$0xff] %v2188_v40  ;;  %v2469_v40 = vld [vmem:[%s3671_s13 + $0xc8] sm:$0xff] }
  0x4c   :  { %3770 = vst [vmem:[#allocation67_spill] sm:$0xff] %v2193_v25  ;;  %v2278_v25 = vld [vmem:[%s3670_s12 + $0x1a0] sm:$0xff] }
  0x4d   :  { %3771 = vst [vmem:[#allocation68_spill] sm:$0xff] %v2198_v41  ;;  %v2499_v41 = vld [vmem:[%s3671_s13 + $0xf8] sm:$0xff] }
  0x4e   :  { %3774 = vst [vmem:[#allocation71_spill] sm:$0xff] %v2213_v39 }
  0x4f   :  { %304 = vmatmul.f32.gmra.mxu3 %v1800_v4  ;;  %3779 = vst [vmem:[#allocation76_spill] sm:$0xff] %v2238_v38  ;;  %v2539_v38 = vld [vmem:[%s3671_s13 + $0x138] sm:$0xff] }
  0x50   :  { %3780 = vst [vmem:[#allocation77_spill] sm:$0xff] %v2243_v48  ;;  %v2574_v48 = vld [vmem:[%s3671_s13 + $0x170] sm:$0xff] }
  0x51   :  { %3781 = vst [vmem:[#allocation78_spill] sm:$0xff] %v2248_v54  ;;  %v2529_v54 = vld [vmem:[%s3671_s13 + $0x128] sm:$0xff] }
  0x52   :  { %3782 = vst [vmem:[#allocation79_spill] sm:$0xff] %v2253_v60  ;;  %v2291_v60 = vld [vmem:[%s3670_s12 + $0x1b0] sm:$0xff] }
  0x53   :  { %3783 = vst [vmem:[#allocation80_spill] sm:$0xff] %v2258_v1  ;;  %v2559_v1 = vld [vmem:[%s3671_s13 + $0x158] sm:$0xff] }
  0x54   :  { %3784 = vst [vmem:[#allocation81_spill] sm:$0xff] %v2263_v7  ;;  %v2594_v7 = vld [vmem:[%s3671_s13 + $0x190] sm:$0xff] }
  0x55   :  { %3786 = vst [vmem:[#allocation83_spill] sm:$0xff] %v2273_v6  ;;  %v2296_v6 = vld [vmem:[%s3670_s12 + $0x1b8] sm:$0xff] }
  0x56   :  { %3787 = vst [vmem:[#allocation84_spill] sm:$0xff] %v2278_v25  ;;  %v2579_v25 = vld [vmem:[%s3671_s13 + $0x178] sm:$0xff] }
  0x57   :  { %3790 = vst [vmem:[#allocation87_spill] sm:$0xff] %v2291_v60  ;;  %v2569_v60 = vld [vmem:[%s3671_s13 + $0x168] sm:$0xff] }
  0x58   :  { %3791 = vst [vmem:[#allocation88_spill] sm:$0xff] %v2296_v6  ;;  %v2321_v6 = vld [vmem:[%s3670_s12 + $0x1e0] sm:$0xff] }
  0x59   :  { %3794 = vst [vmem:[#allocation91_spill] sm:$0xff] %v2311_v47  ;;  %v2589_v47 = vld [vmem:[%s3671_s13 + $0x188] sm:$0xff] }
  0x5a   :  { %3795 = vst [vmem:[#allocation92_spill] sm:$0xff] %v2316_v42  ;;  %v2341_v42 = vld [vmem:[%s3671_s13] sm:$0xff] }
  0x5b   :  { %3796 = vst [vmem:[#allocation93_spill] sm:$0xff] %v2321_v6  ;;  %v2619_v6 = vld [vmem:[%s3671_s13 + $0x1b8] sm:$0xff] }
  0x5c   :  { %3797 = vst [vmem:[#allocation94_spill] sm:$0xff] %v2326_v53  ;;  %v2649_v53 = vld [vmem:[%s3671_s13 + $0x1e8] sm:$0xff] }
  0x5d   :  { %3798 = vst [vmem:[#allocation95_spill] sm:$0xff] %v2331_v49  ;;  %v2609_v49 = vld [vmem:[%s3671_s13 + $0x1a8] sm:$0xff] }
  0x5e   :  { %3799 = vst [vmem:[#allocation96_spill] sm:$0xff] %v2336_v59  ;;  %v2361_v59 = vld [vmem:[%s3671_s13 + $0x20] sm:$0xff] }
  0x5f   :  { %3800 = vst [vmem:[#allocation97_spill] sm:$0xff] %v2341_v42  ;;  %v2639_v42 = vld [vmem:[%s3671_s13 + $0x1d8] sm:$0xff] }
  0x60   :  { %3801 = vst [vmem:[#allocation98_spill] sm:$0xff] %v2346_v43  ;;  %v2654_v43 = vld [vmem:[%s3671_s13 + $0x1f0] sm:$0xff] }
  0x61   :  { %3802 = vst [vmem:[#allocation99_spill] sm:$0xff] %v2351_v56  ;;  %v2629_v56 = vld [vmem:[%s3671_s13 + $0x1c8] sm:$0xff] }
  0x62   :  { %3803 = vst [vmem:[#allocation100_spill] sm:$0xff] %v2356_v0  ;;  %v2381_v0 = vld [vmem:[%s3671_s13 + $0x40] sm:$0xff] }
  0x63   :  { %3804 = vst [vmem:[#allocation101_spill] sm:$0xff] %v2361_v59  ;;  %v2674_v59 = vld [vmem:[%s3672_s14 + $0x10] sm:$0xff] }
  0x64   :  { %3805 = vst [vmem:[#allocation102_spill] sm:$0xff] %v2366_v52  ;;  %v2679_v52 = vld [vmem:[%s3672_s14 + $0x18] sm:$0xff] }
  0x65   :  { %3806 = vst [vmem:[#allocation103_spill] sm:$0xff] %v2371_v61  ;;  %v2669_v61 = vld [vmem:[%s3672_s14 + $0x8] sm:$0xff] }
  0x66   :  { %3807 = vst [vmem:[#allocation104_spill] sm:$0xff] %v2376_v5  ;;  %v2396_v5 = vld [vmem:[%s3671_s13 + $0x58] sm:$0xff] }
  0x67   :  { %3808 = vst [vmem:[#allocation105_spill] sm:$0xff] %v2381_v0 }
  0x68   :  { %3810 = vst [vmem:[#allocation107_spill] sm:$0xff] %v2396_v5  ;;  %v2419_v5 = vld [vmem:[%s3671_s13 + $0x78] sm:$0xff] }
  0x69   :  { %3812 = vst [vmem:[#allocation109_spill] sm:$0xff] %v2414_v3 }
  0x6a   :  { %3813 = vst [vmem:[#allocation110_spill] sm:$0xff] %v2419_v5  ;;  %v2444_v5 = vld [vmem:[%s3671_s13 + $0xa0] sm:$0xff] }
  0x6b   :  { %3818 = vst [vmem:[#allocation115_spill] sm:$0xff] %v2444_v5 }
  0x6c   :  { %3820 = vst [vmem:[#allocation117_spill] sm:$0xff] %v2459_v58  ;;  %v2484_v58 = vld [vmem:[%s3671_s13 + $0xe0] sm:$0xff] }
  0x6d   :  { %3824 = vst [vmem:[#allocation121_spill] sm:$0xff] %v2494_v29 }
  0x6e   :  { %3825 = vst [vmem:[#allocation122_spill] sm:$0xff] %v2499_v41  ;;  %v2524_v41 = vld [vmem:[%s3671_s13 + $0x120] sm:$0xff] }
  0x6f   :  { %3831 = vst [vmem:[#allocation128_spill] sm:$0xff] %v2539_v38  ;;  %v2564_v38 = vld [vmem:[%s3671_s13 + $0x160] sm:$0xff] }
  0x70   :  { %3833 = vst [vmem:[#allocation130_spill] sm:$0xff] %v2559_v1  ;;  %v2584_v1 = vld [vmem:[%s3671_s13 + $0x180] sm:$0xff] }
  0x71   :  { %3834 = vst [vmem:[#allocation131_spill] sm:$0xff] %v2579_v25  ;;  %v2604_v25 = vld [vmem:[%s3671_s13 + $0x1a0] sm:$0xff] }
  0x72   :  { %3835 = vst [vmem:[#allocation132_spill] sm:$0xff] %v2584_v1 }
  0x73   :  { %3836 = vst [vmem:[#allocation133_spill] sm:$0xff] %v2594_v7 }
  0x74   :  { %3838 = vst [vmem:[#allocation135_spill] sm:$0xff] %v2604_v25 }
  0x75   :  { %3840 = vst [vmem:[#allocation137_spill] sm:$0xff] %v2619_v6  ;;  %v2644_v6 = vld [vmem:[%s3671_s13 + $0x1e0] sm:$0xff] }
  0x76   :  { %3842 = vst [vmem:[#allocation139_spill] sm:$0xff] %v2639_v42  ;;  %v2664_v42 = vld [vmem:[%s3672_s14] sm:$0xff] }
  0x77   :  { %3843 = vst [vmem:[#allocation140_spill] sm:$0xff] %v2644_v6 }
  0x78   :  { %3844 = vst [vmem:[#allocation141_spill] sm:$0xff] %v2659_v18  ;;  %v2684_v18 = vld [vmem:[%s3672_s14 + $0x20] sm:$0xff] }
  0x79   :  { %3845 = vst [vmem:[#allocation142_spill] sm:$0xff] %v2664_v42  ;;  %v2689_v42 = vld [vmem:[%s3672_s14 + $0x28] sm:$0xff] }
  0x7a   :  { %3846 = vst [vmem:[#allocation143_spill] sm:$0xff] %v2669_v61  ;;  %v2694_v61 = vld [vmem:[%s3672_s14 + $0x30] sm:$0xff] }
  0x7b   :  { %3847 = vst [vmem:[#allocation144_spill] sm:$0xff] %v2674_v59  ;;  %v2699_v59 = vld [vmem:[%s3672_s14 + $0x38] sm:$0xff] }
  0x7c   :  { %3848 = vst [vmem:[#allocation145_spill] sm:$0xff] %v2679_v52  ;;  %v2704_v52 = vld [vmem:[%s3672_s14 + $0x40] sm:$0xff] }
  0x7d   :  { %3849 = vst [vmem:[#allocation146_spill] sm:$0xff] %v2684_v18  ;;  %v2709_v18 = vld [vmem:[%s3672_s14 + $0x48] sm:$0xff] }
  0x7e   :  { %3850 = vst [vmem:[#allocation147_spill] sm:$0xff] %v2689_v42  ;;  %v2714_v42 = vld [vmem:[%s3672_s14 + $0x50] sm:$0xff] }
  0x7f   :  { %3851 = vst [vmem:[#allocation148_spill] sm:$0xff] %v2694_v61  ;;  %v2719_v61 = vld [vmem:[%s3672_s14 + $0x58] sm:$0xff] }
  0x80   :  { %3852 = vst [vmem:[#allocation149_spill] sm:$0xff] %v2699_v59  ;;  %v2724_v59 = vld [vmem:[%s3672_s14 + $0x60] sm:$0xff] }
  0x81   :  { %3853 = vst [vmem:[#allocation150_spill] sm:$0xff] %v2704_v52  ;;  %v2729_v52 = vld [vmem:[%s3672_s14 + $0x68] sm:$0xff] }
  0x82   :  { %3854 = vst [vmem:[#allocation151_spill] sm:$0xff] %v2709_v18  ;;  %v2734_v18 = vld [vmem:[%s3672_s14 + $0x70] sm:$0xff] }
  0x83   :  { %3855 = vst [vmem:[#allocation152_spill] sm:$0xff] %v2714_v42  ;;  %v2739_v42 = vld [vmem:[%s3672_s14 + $0x78] sm:$0xff] }
  0x84   :  { %3856 = vst [vmem:[#allocation153_spill] sm:$0xff] %v2719_v61  ;;  %v2744_v61 = vld [vmem:[%s3672_s14 + $0x80] sm:$0xff] }
  0x85   :  { %3857 = vst [vmem:[#allocation154_spill] sm:$0xff] %v2724_v59  ;;  %v2749_v59 = vld [vmem:[%s3672_s14 + $0x88] sm:$0xff] }
  0x86   :  { %3858 = vst [vmem:[#allocation155_spill] sm:$0xff] %v2729_v52  ;;  %v2754_v52 = vld [vmem:[%s3672_s14 + $0x90] sm:$0xff] }
  0x87   :  { %3859 = vst [vmem:[#allocation156_spill] sm:$0xff] %v2734_v18  ;;  %v2759_v18 = vld [vmem:[%s3672_s14 + $0x98] sm:$0xff] }
  0x88   :  { %3860 = vst [vmem:[#allocation157_spill] sm:$0xff] %v2739_v42  ;;  %v2764_v42 = vld [vmem:[%s3672_s14 + $0xa0] sm:$0xff] }
  0x89   :  { %3861 = vst [vmem:[#allocation158_spill] sm:$0xff] %v2744_v61  ;;  %v2769_v61 = vld [vmem:[%s3672_s14 + $0xa8] sm:$0xff] }
  0x8a   :  { %3862 = vst [vmem:[#allocation159_spill] sm:$0xff] %v2749_v59  ;;  %v2774_v59 = vld [vmem:[%s3672_s14 + $0xb0] sm:$0xff] }
  0x8b   :  { %3863 = vst [vmem:[#allocation160_spill] sm:$0xff] %v2754_v52  ;;  %v2779_v52 = vld [vmem:[%s3672_s14 + $0xb8] sm:$0xff] }
  0x8c   :  { %3864 = vst [vmem:[#allocation161_spill] sm:$0xff] %v2759_v18  ;;  %v2784_v18 = vld [vmem:[%s3672_s14 + $0xc0] sm:$0xff] }
  0x8d   :  { %3865 = vst [vmem:[#allocation162_spill] sm:$0xff] %v2764_v42  ;;  %v2789_v42 = vld [vmem:[%s3672_s14 + $0xc8] sm:$0xff] }
  0x8e   :  { %3866 = vst [vmem:[#allocation163_spill] sm:$0xff] %v2769_v61  ;;  %v2794_v61 = vld [vmem:[%s3672_s14 + $0xd0] sm:$0xff] }
  0x8f   :  { %3867 = vst [vmem:[#allocation164_spill] sm:$0xff] %v2774_v59  ;;  %v2799_v59 = vld [vmem:[%s3672_s14 + $0xd8] sm:$0xff] }
  0x90   :  { %3868 = vst [vmem:[#allocation165_spill] sm:$0xff] %v2779_v52  ;;  %v2804_v52 = vld [vmem:[%s3672_s14 + $0xe0] sm:$0xff] }
  0x91   :  { %3869 = vst [vmem:[#allocation166_spill] sm:$0xff] %v2784_v18  ;;  %v2809_v18 = vld [vmem:[%s3672_s14 + $0xe8] sm:$0xff] }
  0x92   :  { %3870 = vst [vmem:[#allocation167_spill] sm:$0xff] %v2789_v42  ;;  %v2814_v42 = vld [vmem:[%s3672_s14 + $0xf0] sm:$0xff] }
  0x93   :  { %3871 = vst [vmem:[#allocation168_spill] sm:$0xff] %v2794_v61  ;;  %v2819_v61 = vld [vmem:[%s3672_s14 + $0xf8] sm:$0xff] }
  0x94   :  { %3872 = vst [vmem:[#allocation169_spill] sm:$0xff] %v2799_v59  ;;  %v2824_v59 = vld [vmem:[%s3672_s14 + $0x100] sm:$0xff] }
  0x95   :  { %3873 = vst [vmem:[#allocation170_spill] sm:$0xff] %v2804_v52  ;;  %v2829_v52 = vld [vmem:[%s3672_s14 + $0x108] sm:$0xff] }
  0x96   :  { %3874 = vst [vmem:[#allocation171_spill] sm:$0xff] %v2809_v18  ;;  %v2834_v18 = vld [vmem:[%s3672_s14 + $0x110] sm:$0xff] }
  0x97   :  { %3875 = vst [vmem:[#allocation172_spill] sm:$0xff] %v2814_v42  ;;  %v2839_v42 = vld [vmem:[%s3672_s14 + $0x118] sm:$0xff] }
  0x98   :  { %3876 = vst [vmem:[#allocation173_spill] sm:$0xff] %v2819_v61  ;;  %v2844_v61 = vld [vmem:[%s3672_s14 + $0x120] sm:$0xff] }
  0x99   :  { %3877 = vst [vmem:[#allocation174_spill] sm:$0xff] %v2824_v59  ;;  %v2849_v59 = vld [vmem:[%s3672_s14 + $0x128] sm:$0xff] }
  0x9a   :  { %3878 = vst [vmem:[#allocation175_spill] sm:$0xff] %v2829_v52  ;;  %v2854_v52 = vld [vmem:[%s3672_s14 + $0x130] sm:$0xff] }
  0x9b   :  { %3879 = vst [vmem:[#allocation176_spill] sm:$0xff] %v2834_v18  ;;  %v2859_v18 = vld [vmem:[%s3672_s14 + $0x138] sm:$0xff] }
  0x9c   :  { %3880 = vst [vmem:[#allocation177_spill] sm:$0xff] %v2839_v42  ;;  %v2864_v42 = vld [vmem:[%s3672_s14 + $0x140] sm:$0xff] }
  0x9d   :  { %3881 = vst [vmem:[#allocation178_spill] sm:$0xff] %v2844_v61  ;;  %v2869_v61 = vld [vmem:[%s3672_s14 + $0x148] sm:$0xff] }
  0x9e   :  { %3882 = vst [vmem:[#allocation179_spill] sm:$0xff] %v2849_v59  ;;  %v2874_v59 = vld [vmem:[%s3672_s14 + $0x150] sm:$0xff] }
  0x9f   :  { %3883 = vst [vmem:[#allocation180_spill] sm:$0xff] %v2854_v52  ;;  %v2879_v52 = vld [vmem:[%s3672_s14 + $0x158] sm:$0xff] }
  0xa0   :  { %3884 = vst [vmem:[#allocation181_spill] sm:$0xff] %v2859_v18  ;;  %v2884_v18 = vld [vmem:[%s3672_s14 + $0x160] sm:$0xff] }
  0xa1   :  { %3885 = vst [vmem:[#allocation182_spill] sm:$0xff] %v2864_v42  ;;  %v2889_v42 = vld [vmem:[%s3672_s14 + $0x168] sm:$0xff] }
  0xa2   :  { %3886 = vst [vmem:[#allocation183_spill] sm:$0xff] %v2869_v61  ;;  %v2894_v61 = vld [vmem:[%s3672_s14 + $0x170] sm:$0xff] }
  0xa3   :  { %3887 = vst [vmem:[#allocation184_spill] sm:$0xff] %v2874_v59  ;;  %v2899_v59 = vld [vmem:[%s3672_s14 + $0x178] sm:$0xff] }
  0xa4   :  { %3888 = vst [vmem:[#allocation185_spill] sm:$0xff] %v2879_v52  ;;  %v2904_v52 = vld [vmem:[%s3672_s14 + $0x180] sm:$0xff] }
  0xa5   :  { %3889 = vst [vmem:[#allocation186_spill] sm:$0xff] %v2884_v18  ;;  %v2909_v18 = vld [vmem:[%s3672_s14 + $0x188] sm:$0xff] }
  0xa6   :  { %3890 = vst [vmem:[#allocation187_spill] sm:$0xff] %v2889_v42  ;;  %v2914_v42 = vld [vmem:[%s3672_s14 + $0x190] sm:$0xff] }
  0xa7   :  { %3891 = vst [vmem:[#allocation188_spill] sm:$0xff] %v2894_v61  ;;  %v2919_v61 = vld [vmem:[%s3672_s14 + $0x198] sm:$0xff] }
  0xa8   :  { %3892 = vst [vmem:[#allocation189_spill] sm:$0xff] %v2899_v59  ;;  %v2924_v59 = vld [vmem:[%s3672_s14 + $0x1a0] sm:$0xff] }
  0xa9   :  { %3893 = vst [vmem:[#allocation190_spill] sm:$0xff] %v2904_v52  ;;  %v2929_v52 = vld [vmem:[%s3672_s14 + $0x1a8] sm:$0xff] }
  0xaa   :  { %3894 = vst [vmem:[#allocation191_spill] sm:$0xff] %v2909_v18  ;;  %v2934_v18 = vld [vmem:[%s3672_s14 + $0x1b0] sm:$0xff] }
  0xab   :  { %3895 = vst [vmem:[#allocation192_spill] sm:$0xff] %v2914_v42  ;;  %v2939_v42 = vld [vmem:[%s3672_s14 + $0x1b8] sm:$0xff] }
  0xac   :  { %3896 = vst [vmem:[#allocation193_spill] sm:$0xff] %v2919_v61  ;;  %v2944_v61 = vld [vmem:[%s3672_s14 + $0x1c0] sm:$0xff] }
  0xad   :  { %3897 = vst [vmem:[#allocation194_spill] sm:$0xff] %v2924_v59  ;;  %v2949_v59 = vld [vmem:[%s3672_s14 + $0x1c8] sm:$0xff] }
  0xae   :  { %3898 = vst [vmem:[#allocation195_spill] sm:$0xff] %v2929_v52  ;;  %v2954_v52 = vld [vmem:[%s3672_s14 + $0x1d0] sm:$0xff] }
  0xaf   :  { %3899 = vst [vmem:[#allocation196_spill] sm:$0xff] %v2934_v18  ;;  %v2959_v18 = vld [vmem:[%s3672_s14 + $0x1d8] sm:$0xff] }
  0xb0   :  { %v206_v17 = vpop.f32.mrf.mxu0  ;;  %3900 = vst [vmem:[#allocation197_spill] sm:$0xff] %v2939_v42  ;;  %v2964_v42 = vld [vmem:[%s3672_s14 + $0x1e0] sm:$0xff] }
  0xb1   :  { %v207_v21 = vadd.f32 %v1446_v10, %v206_v17  ;;  %v2112_v10 = vld [vmem:[%s3670_s12 + $0xa0] sm:$0xff]  ;;  %3901 = vst [vmem:[#allocation198_spill] sm:$0xff] %v2944_v61  ;;  %v2969_v61 = vld [vmem:[%s3672_s14 + $0x1e8] sm:$0xff] }
  0xb2   :  { %v293_v11 = vpop.f32.mrf.mxu3  ;;  %v284_v12 = vpop.f32.mrf.mxu2  ;;  %3753 = vst [vmem:[#allocation50_spill] sm:$0xff] %v2112_v10  ;;  %v2132_v17 = vld [vmem:[%s3670_s12 + $0xc0] sm:$0xff] }
  0xb3   :  { %v1902_v14 = vadd.f32 %v1893_v9, %v293_v11  ;;  %v1905_v16 = vadd.f32 %v1893_v9, %v284_v12  ;;  %v247_v24 = vpop.f32.mrf.mxu1  ;;  %1450 = vtanh.f32 %v207_v21  ;;  %v2117_v11 = vld [vmem:[%s3670_s12 + $0xa8] sm:$0xff]  ;;  %v2122_v12 = vld [vmem:[%s3670_s12 + $0xb0] sm:$0xff]  ;;  %3757 = vst [vmem:[#allocation54_spill] sm:$0xff] %v2132_v17  ;;  %v2439_v17 = vld [vmem:[%s3671_s13 + $0x98] sm:$0xff] }
  0xb4   :  { %v248_v30 = vadd.f32 %v1447_v13, %v247_v24  ;;  %3754 = vst [vmem:[#allocation51_spill] sm:$0xff] %v2117_v11  ;;  %v2127_v13 = vld [vmem:[%s3670_s12 + $0xb8] sm:$0xff]  ;;  %v2137_v21 = vld [vmem:[%s3670_s12 + $0xc8] sm:$0xff]  ;;  %v2454_v11 = vld [vmem:[%s3671_s13 + $0xb0] sm:$0xff] }
  0xb5   :  { %3714 = vst [vmem:[#allocation11_spill] sm:$0xff] %v1902_v14  ;;  %v2228_v14 = vld [vmem:[%s3670_s12 + $0x150] sm:$0xff] }
  0xb6   :  { %3715 = vst [vmem:[#allocation12_spill] sm:$0xff] %v1905_v16  ;;  %1452 = vtanh.f32 %v248_v30  ;;  %v2233_v16 = vld [vmem:[%s3670_s12 + $0x158] sm:$0xff] }
  0xb7   :  { %3755 = vst [vmem:[#allocation52_spill] sm:$0xff] %v2122_v12  ;;  %v2391_v12 = vld [vmem:[%s3671_s13 + $0x50] sm:$0xff] }
  0xb8   :  { %3756 = vst [vmem:[#allocation53_spill] sm:$0xff] %v2127_v13 }
  0xb9   :  { %v2045_v55 = vpop.eup %1450   ;;  %3758 = vst [vmem:[#allocation55_spill] sm:$0xff] %v2137_v21  ;;  %v2474_v21 = vld [vmem:[%s3671_s13 + $0xd0] sm:$0xff] }
  0xba   :  { %v296_v45 = vpop.f32.mrf.mxu3  ;;  %v287_v46 = vpop.f32.mrf.mxu2  ;;  %3777 = vst [vmem:[#allocation74_spill] sm:$0xff] %v2228_v14  ;;  %v2509_v14 = vld [vmem:[%s3671_s13 + $0x108] sm:$0xff] }
  0xbb   :  { %v2025_v50 = vadd.f32 %v1893_v9, %v296_v45  ;;  %v2028_v51 = vadd.f32 %v1893_v9, %v287_v46  ;;  %v2142_v45 = vld [vmem:[%s3670_s12 + $0xd0] sm:$0xff]  ;;  %v2147_v46 = vld [vmem:[%s3670_s12 + $0xd8] sm:$0xff]  ;;  %3778 = vst [vmem:[#allocation75_spill] sm:$0xff] %v2233_v16  ;;  %v2286_v16 = vld [vmem:[%s3670_s12 + $0x1a8] sm:$0xff] }
  0xbc   :  { %v2077_v63 = vpop.eup %1452   ;;  %3759 = vst [vmem:[#allocation56_spill] sm:$0xff] %v2142_v45  ;;  %v2409_v45 = vld [vmem:[%s3671_s13 + $0x68] sm:$0xff] }
  0xbd   :  { %3736 = vst [vmem:[#allocation33_spill] sm:$0xff] %v2025_v50  ;;  %v2208_v50 = vld [vmem:[%s3670_s12 + $0x130] sm:$0xff] }
  0xbe   :  { %3737 = vst [vmem:[#allocation34_spill] sm:$0xff] %v2028_v51  ;;  %v2218_v51 = vld [vmem:[%s3670_s12 + $0x140] sm:$0xff] }
  0xbf   :  { %3760 = vst [vmem:[#allocation57_spill] sm:$0xff] %v2147_v46  ;;  %v2268_v46 = vld [vmem:[%s3670_s12 + $0x190] sm:$0xff] }
  0xc0   :  { %3773 = vst [vmem:[#allocation70_spill] sm:$0xff] %v2208_v50  ;;  %v2489_v50 = vld [vmem:[%s3671_s13 + $0xe8] sm:$0xff] }
  0xc1   :  { %3775 = vst [vmem:[#allocation72_spill] sm:$0xff] %v2218_v51  ;;  %v2519_v51 = vld [vmem:[%s3671_s13 + $0x118] sm:$0xff] }
  0xc2   :  { %v299_v24 = vpop.f32.mrf.mxu3  ;;  %v290_v30 = vpop.f32.mrf.mxu2  ;;  %3785 = vst [vmem:[#allocation82_spill] sm:$0xff] %v2268_v46  ;;  %v2549_v46 = vld [vmem:[%s3671_s13 + $0x148] sm:$0xff] }
  0xc3   :  { %v2155_v15 = vadd.f32 %v1893_v9, %v299_v24  ;;  %v2158_v4 = vadd.f32 %v1893_v9, %v290_v30  ;;  %v2178_v24 = vld [vmem:[%s3670_s12 + $0x100] sm:$0xff]  ;;  %v2183_v30 = vld [vmem:[%s3670_s12 + $0x108] sm:$0xff]  ;;  %3789 = vst [vmem:[#allocation86_spill] sm:$0xff] %v2286_v16  ;;  %v2614_v16 = vld [vmem:[%s3671_s13 + $0x1b0] sm:$0xff] }
  0xc4   :  { %3767 = vst [vmem:[#allocation64_spill] sm:$0xff] %v2178_v24  ;;  %v2479_v24 = vld [vmem:[%s3671_s13 + $0xd8] sm:$0xff] }
  0xc5   :  { %3762 = vst [vmem:[#allocation59_spill] sm:$0xff] %v2155_v15  ;;  %v2203_v15 = vld [vmem:[%s3670_s12 + $0x128] sm:$0xff] }
  0xc6   :  { %3763 = vst [vmem:[#allocation60_spill] sm:$0xff] %v2158_v4  ;;  %v2223_v4 = vld [vmem:[%s3670_s12 + $0x148] sm:$0xff] }
  0xc7   :  { %3768 = vst [vmem:[#allocation65_spill] sm:$0xff] %v2183_v30  ;;  %v2514_v30 = vld [vmem:[%s3671_s13 + $0x110] sm:$0xff] }
  0xc8   :  { %3772 = vst [vmem:[#allocation69_spill] sm:$0xff] %v2203_v15  ;;  %v2534_v15 = vld [vmem:[%s3671_s13 + $0x130] sm:$0xff] }
  0xc9   :  { %3776 = vst [vmem:[#allocation73_spill] sm:$0xff] %v2223_v4  ;;  %v2554_v4 = vld [vmem:[%s3671_s13 + $0x150] sm:$0xff] }
  0xca   :  { %v302_v13 = vpop.f32.mrf.mxu3  ;;  %3809 = vst [vmem:[#allocation106_spill] sm:$0xff] %v2391_v12 }
  0xcb   :  { %v2281_v39 = vadd.f32 %v1893_v9, %v302_v13  ;;  %v2301_v13 = vld [vmem:[%s3670_s12 + $0x1c0] sm:$0xff]  ;;  %3817 = vst [vmem:[#allocation114_spill] sm:$0xff] %v2439_v17 }
  0xcc   :  { %3792 = vst [vmem:[#allocation89_spill] sm:$0xff] %v2301_v13  ;;  %v2464_v17 = vld [vmem:[%s3671_s13 + $0xc0] sm:$0xff]  ;;  %v2599_v13 = vld [vmem:[%s3671_s13 + $0x198] sm:$0xff] }
  0xcd   :  { %3788 = vst [vmem:[#allocation85_spill] sm:$0xff] %v2281_v39  ;;  %v2306_v39 = vld [vmem:[%s3670_s12 + $0x1c8] sm:$0xff] }
  0xce   :  { %3793 = vst [vmem:[#allocation90_spill] sm:$0xff] %v2306_v39  ;;  %v2634_v39 = vld [vmem:[%s3671_s13 + $0x1d0] sm:$0xff] }
  0xcf   :  { %3819 = vst [vmem:[#allocation116_spill] sm:$0xff] %v2454_v11 }
  0xd0   :  { %3821 = vst [vmem:[#allocation118_spill] sm:$0xff] %v2464_v17 }
  0xd1   :  { %3822 = vst [vmem:[#allocation119_spill] sm:$0xff] %v2474_v21 }
  0xd2   :  { %v305_v2 = vpop.f32.mrf.mxu3  ;;  %3823 = vst [vmem:[#allocation120_spill] sm:$0xff] %v2479_v24  ;;  %v2504_v24 = vld [vmem:[%s3671_s13 + $0x100] sm:$0xff] }
  0xd3   :  { %v2404_v10 = vadd.f32 %v1893_v9, %v305_v2  ;;  %v2424_v9 = vld [vmem:[%s3671_s13 + $0x80] sm:$0xff]  ;;  %v2429_v2 = vld [vmem:[%s3671_s13 + $0x88] sm:$0xff]  ;;  %3826 = vst [vmem:[#allocation123_spill] sm:$0xff] %v2504_v24 }
  0xd4   :  { %3814 = vst [vmem:[#allocation111_spill] sm:$0xff] %v2424_v9 }
  0xd5   :  { %3811 = vst [vmem:[#allocation108_spill] sm:$0xff] %v2404_v10  ;;  %v2434_v10 = vld [vmem:[%s3671_s13 + $0x90] sm:$0xff] }
  0xd6   :  { %3815 = vst [vmem:[#allocation112_spill] sm:$0xff] %v2429_v2 }
  0xd7   :  { %3816 = vst [vmem:[#allocation113_spill] sm:$0xff] %v2434_v10 }
  0xd8   :  { %3827 = vst [vmem:[#allocation124_spill] sm:$0xff] %v2509_v14 }
  0xd9   :  { %3828 = vst [vmem:[#allocation125_spill] sm:$0xff] %v2514_v30 }
  0xda   :  { %3829 = vst [vmem:[#allocation126_spill] sm:$0xff] %v2519_v51  ;;  %v2544_v51 = vld [vmem:[%s3671_s13 + $0x140] sm:$0xff] }
  0xdb   :  { %3830 = vst [vmem:[#allocation127_spill] sm:$0xff] %v2534_v15 }
  0xdc   :  { %3832 = vst [vmem:[#allocation129_spill] sm:$0xff] %v2554_v4 }
  0xdd   :  { %3837 = vst [vmem:[#allocation134_spill] sm:$0xff] %v2599_v13  ;;  %v2624_v13 = vld [vmem:[%s3671_s13 + $0x1c0] sm:$0xff] }
  0xde   :  { %3839 = vst [vmem:[#allocation136_spill] sm:$0xff] %v2614_v16 }
  0xdf   :  { %3841 = vst [vmem:[#allocation138_spill] sm:$0xff] %v2624_v13 }
  0xe0   :  { %3902 = vst [vmem:[#allocation199_spill] sm:$0xff] %v2949_v59  ;;  %v2974_v59 = vld [vmem:[%s3672_s14 + $0x1f0] sm:$0xff] }
  0xe1   :  { %3903 = vst [vmem:[#allocation200_spill] sm:$0xff] %v2954_v52  ;;  %v2979_v52 = vld [vmem:[%s3672_s14 + $0x1f8] sm:$0xff] }
  0xe2   :  { %3904 = vst [vmem:[#allocation201_spill] sm:$0xff] %v2959_v18  ;;  %v2984_v18 = vld [vmem:[%s3673_s15] sm:$0xf] }
  0xe3   :  { %3905 = vst [vmem:[#allocation202_spill] sm:$0xff] %v2964_v42  ;;  %v2989_v42 = vld [vmem:[%s3674_s16] sm:$0xff] }
  0xe4   :  { %3906 = vst [vmem:[#allocation203_spill] sm:$0xff] %v2969_v61  ;;  %v2994_v61 = vld [vmem:[%s3674_s16 + $0x8] sm:$0xff] }
  0xe5   :  { %3907 = vst [vmem:[#allocation204_spill] sm:$0xff] %v2974_v59  ;;  %v2999_v59 = vld [vmem:[%s3674_s16 + $0x10] sm:$0xff] }
  0xe6   :  { %3908 = vst [vmem:[#allocation205_spill] sm:$0xff] %v2979_v52  ;;  %v3004_v52 = vld [vmem:[%s3674_s16 + $0x18] sm:$0xff] }
  0xe7   :  { %3909 = vst [vmem:[#allocation206_spill] sm:$0xff] %v2984_v18  ;;  %v3009_v18 = vld [vmem:[%s3674_s16 + $0x20] sm:$0xff] }
  0xe8   :  { %3910 = vst [vmem:[#allocation207_spill] sm:$0xff] %v2989_v42  ;;  %v3014_v42 = vld [vmem:[%s3674_s16 + $0x28] sm:$0xff] }
  0xe9   :  { %3911 = vst [vmem:[#allocation208_spill] sm:$0xff] %v2994_v61  ;;  %v3019_v61 = vld [vmem:[%s3674_s16 + $0x30] sm:$0xff] }
  0xea   :  { %3912 = vst [vmem:[#allocation209_spill] sm:$0xff] %v2999_v59  ;;  %v3024_v59 = vld [vmem:[%s3674_s16 + $0x38] sm:$0xff] }
  0xeb   :  { %3913 = vst [vmem:[#allocation210_spill] sm:$0xff] %v3004_v52  ;;  %v3029_v52 = vld [vmem:[%s3674_s16 + $0x40] sm:$0xff] }
  0xec   :  { %3914 = vst [vmem:[#allocation211_spill] sm:$0xff] %v3009_v18  ;;  %v3034_v18 = vld [vmem:[%s3674_s16 + $0x48] sm:$0xff] }
  0xed   :  { %3915 = vst [vmem:[#allocation212_spill] sm:$0xff] %v3014_v42  ;;  %v3039_v42 = vld [vmem:[%s3674_s16 + $0x50] sm:$0xff] }
  0xee   :  { %3916 = vst [vmem:[#allocation213_spill] sm:$0xff] %v3019_v61  ;;  %v3044_v61 = vld [vmem:[%s3674_s16 + $0x58] sm:$0xff] }
  0xef   :  { %3917 = vst [vmem:[#allocation214_spill] sm:$0xff] %v3024_v59  ;;  %v3049_v59 = vld [vmem:[%s3674_s16 + $0x60] sm:$0xff] }
  0xf0   :  { %3918 = vst [vmem:[#allocation215_spill] sm:$0xff] %v3029_v52  ;;  %v3054_v52 = vld [vmem:[%s3674_s16 + $0x68] sm:$0xff] }
  0xf1   :  { %3919 = vst [vmem:[#allocation216_spill] sm:$0xff] %v3034_v18  ;;  %v3059_v18 = vld [vmem:[%s3674_s16 + $0x70] sm:$0xff] }
  0xf2   :  { %3920 = vst [vmem:[#allocation217_spill] sm:$0xff] %v3039_v42  ;;  %v3064_v42 = vld [vmem:[%s3674_s16 + $0x78] sm:$0xff] }
  0xf3   :  { %3921 = vst [vmem:[#allocation218_spill] sm:$0xff] %v3044_v61  ;;  %v3069_v61 = vld [vmem:[%s3675_s17] sm:$0x1] }
  0xf4   :  { %3922 = vst [vmem:[#allocation219_spill] sm:$0xff] %v3049_v59  ;;  %v3074_v59 = vld [vmem:[%s3676_s18] sm:$0xff] }
  0xf5   :  { %3923 = vst [vmem:[#allocation220_spill] sm:$0xff] %v3054_v52  ;;  %v3079_v52 = vld [vmem:[%s3676_s18 + $0x8] sm:$0xff] }
  0xf6   :  { %3924 = vst [vmem:[#allocation221_spill] sm:$0xff] %v3059_v18  ;;  %v3084_v18 = vld [vmem:[%s3676_s18 + $0x10] sm:$0xff] }
  0xf7   :  { %3925 = vst [vmem:[#allocation222_spill] sm:$0xff] %v3064_v42  ;;  %v3089_v42 = vld [vmem:[%s3676_s18 + $0x18] sm:$0xff] }
  0xf8   :  { %3926 = vst [vmem:[#allocation223_spill] sm:$0xff] %v3069_v61  ;;  %v3094_v61 = vld [vmem:[%s3676_s18 + $0x20] sm:$0xff] }
  0xf9   :  { %3927 = vst [vmem:[#allocation224_spill] sm:$0xff] %v3074_v59  ;;  %v3099_v59 = vld [vmem:[%s3676_s18 + $0x28] sm:$0xff] }
  0xfa   :  { %3928 = vst [vmem:[#allocation225_spill] sm:$0xff] %v3079_v52  ;;  %v3104_v52 = vld [vmem:[%s3676_s18 + $0x30] sm:$0xff] }
  0xfb   :  { %3929 = vst [vmem:[#allocation226_spill] sm:$0xff] %v3084_v18  ;;  %v3109_v18 = vld [vmem:[%s3676_s18 + $0x38] sm:$0xff] }
  0xfc   :  { %3930 = vst [vmem:[#allocation227_spill] sm:$0xff] %v3089_v42  ;;  %v3114_v42 = vld [vmem:[%s3676_s18 + $0x40] sm:$0xff] }
  0xfd   :  { %3931 = vst [vmem:[#allocation228_spill] sm:$0xff] %v3094_v61  ;;  %v3119_v61 = vld [vmem:[%s3676_s18 + $0x48] sm:$0xff] }
  0xfe   :  { %3932 = vst [vmem:[#allocation229_spill] sm:$0xff] %v3099_v59  ;;  %v3124_v59 = vld [vmem:[%s3676_s18 + $0x50] sm:$0xff] }
  0xff   :  { %3933 = vst [vmem:[#allocation230_spill] sm:$0xff] %v3104_v52  ;;  %v3129_v52 = vld [vmem:[%s3676_s18 + $0x58] sm:$0xff] }
 0x100   :  { %3934 = vst [vmem:[#allocation231_spill] sm:$0xff] %v3109_v18  ;;  %v3134_v18 = vld [vmem:[%s3676_s18 + $0x60] sm:$0xff] }
 0x101   :  { %3935 = vst [vmem:[#allocation232_spill] sm:$0xff] %v3114_v42  ;;  %v3139_v42 = vld [vmem:[%s3676_s18 + $0x68] sm:$0xff] }
 0x102   :  { %3936 = vst [vmem:[#allocation233_spill] sm:$0xff] %v3119_v61  ;;  %v3144_v61 = vld [vmem:[%s3676_s18 + $0x70] sm:$0xff] }
 0x103   :  { %3937 = vst [vmem:[#allocation234_spill] sm:$0xff] %v3124_v59  ;;  %v3149_v59 = vld [vmem:[%s3676_s18 + $0x78] sm:$0xff] }
 0x104   :  { %3938 = vst [vmem:[#allocation235_spill] sm:$0xff] %v3129_v52  ;;  %v3154_v52 = vld [vmem:[%s3677_s19] sm:$0x1] }
 0x105   :  { %3939 = vst [vmem:[#allocation236_spill] sm:$0xff] %v3134_v18  ;;  %v3159_v18 = vld [vmem:[%s3678_s20] sm:$0xff] }
 0x106   :  { %3940 = vst [vmem:[#allocation237_spill] sm:$0xff] %v3139_v42  ;;  %v3164_v42 = vld [vmem:[%s3678_s20 + $0x8] sm:$0xff] }
 0x107   :  { %3941 = vst [vmem:[#allocation238_spill] sm:$0xff] %v3144_v61  ;;  %v3169_v61 = vld [vmem:[%s3678_s20 + $0x10] sm:$0xff] }
 0x108   :  { %3942 = vst [vmem:[#allocation239_spill] sm:$0xff] %v3149_v59  ;;  %v3174_v59 = vld [vmem:[%s3678_s20 + $0x18] sm:$0xff] }
 0x109   :  { %3943 = vst [vmem:[#allocation240_spill] sm:$0xff] %v3154_v52  ;;  %v3179_v52 = vld [vmem:[%s3678_s20 + $0x20] sm:$0xff] }
 0x10a   :  { %3944 = vst [vmem:[#allocation241_spill] sm:$0xff] %v3159_v18  ;;  %v3184_v18 = vld [vmem:[%s3678_s20 + $0x28] sm:$0xff] }
 0x10b   :  { %3945 = vst [vmem:[#allocation242_spill] sm:$0xff] %v3164_v42  ;;  %v3189_v42 = vld [vmem:[%s3678_s20 + $0x30] sm:$0xff] }
 0x10c   :  { %3946 = vst [vmem:[#allocation243_spill] sm:$0xff] %v3169_v61  ;;  %v3194_v61 = vld [vmem:[%s3678_s20 + $0x38] sm:$0xff] }
 0x10d   :  { %3947 = vst [vmem:[#allocation244_spill] sm:$0xff] %v3174_v59  ;;  %v3199_v59 = vld [vmem:[%s3678_s20 + $0x40] sm:$0xff] }
 0x10e   :  { %3948 = vst [vmem:[#allocation245_spill] sm:$0xff] %v3179_v52  ;;  %v3204_v52 = vld [vmem:[%s3678_s20 + $0x48] sm:$0xff] }
 0x10f   :  { %3949 = vst [vmem:[#allocation246_spill] sm:$0xff] %v3184_v18  ;;  %v3209_v18 = vld [vmem:[%s3678_s20 + $0x50] sm:$0xff] }
 0x110   :  { %3950 = vst [vmem:[#allocation247_spill] sm:$0xff] %v3189_v42  ;;  %v3214_v42 = vld [vmem:[%s3678_s20 + $0x58] sm:$0xff] }
 0x111   :  { %3951 = vst [vmem:[#allocation248_spill] sm:$0xff] %v3194_v61  ;;  %v3219_v61 = vld [vmem:[%s3678_s20 + $0x60] sm:$0xff] }
 0x112   :  { %3952 = vst [vmem:[#allocation249_spill] sm:$0xff] %v3199_v59  ;;  %v3224_v59 = vld [vmem:[%s3678_s20 + $0x68] sm:$0xff] }
 0x113   :  { %3953 = vst [vmem:[#allocation250_spill] sm:$0xff] %v3204_v52  ;;  %v3229_v52 = vld [vmem:[%s3678_s20 + $0x70] sm:$0xff] }
 0x114   :  { %3954 = vst [vmem:[#allocation251_spill] sm:$0xff] %v3209_v18  ;;  %v3234_v18 = vld [vmem:[%s3678_s20 + $0x78] sm:$0xff] }
 0x115   :  { %3955 = vst [vmem:[#allocation252_spill] sm:$0xff] %v3214_v42  ;;  %v3239_v42 = vld [vmem:[%s3679_s21] sm:$0x1] }
 0x116 LB: > { %594 = vmatpush.msra.mxu0 %v1985_v37  ;;  %965 = vmatpush.msra.mxu2 %v2649_v53  ;;  %v3956_v6 = vld [vmem:[#allocation140_spill] sm:$0xff]  ;;  %v3957_v13 = vld [vmem:[#allocation138_spill] sm:$0xff]  ;;  %v3958_v25 = vld [vmem:[#allocation135_spill] sm:$0xff]  ;;  %vm721_vm8 = vcmask 64512   ;;  %s3453_s20 = sshll.u32 %s1529_s10, 3  ;;  %s4087_s6 = sld [smem:[#allocation254_spill]]  ;;  %s1529_s10 = sphi %s3247_s10, %s588_s10   ;;  %v1525_v55 = vphi %v2045_v55, %v1280_v55   ;;  %v1521_v63 = vphi %v2077_v63, %v1278_v63  }
 0x117   : > { %945 = vmatpush.msra.mxu1 %v3956_v6  ;;  %985 = vmatpush.msra.mxu3 %v2654_v43  ;;  %v3959_v16 = vld [vmem:[#allocation136_spill] sm:$0xff]  ;;  %v3961_v7 = vld [vmem:[#allocation133_spill] sm:$0xff]  ;;  %v3963_v32 = vld [vmem:[#allocation23_spill] sm:$0xff]  ;;  %s4160_s12 = sld [smem:[#allocation257_spill]]  ;;  %s588_s10 = sadd.s32 1, %s1529_s10  }
 0x118   : > { %595 = vmatpush.msra.mxu0 %v1980_v36  ;;  %966 = vmatpush.msra.mxu2 %v2629_v56  ;;  %v3960_v1 = vld [vmem:[#allocation132_spill] sm:$0xff]  ;;  %v3964_v4 = vld [vmem:[#allocation129_spill] sm:$0xff]  ;;  %v3965_v31 = vld [vmem:[#allocation22_spill] sm:$0xff]  ;;  %s4208_s28 = sld [smem:[#allocation256_spill]]  ;;  %p585_p0 = scmp.ge.s32.totalorder %s588_s10, 6  }
 0x119   : > { %946 = vmatpush.msra.mxu1 %v3957_v13  ;;  %986 = vmatpush.msra.mxu3 %v2634_v39  ;;  %v3962_v33 = vld [vmem:[#allocation24_spill] sm:$0xff]  ;;  %v3966_v15 = vld [vmem:[#allocation127_spill] sm:$0xff]  ;;  %v3967_v28 = vld [vmem:[#allocation21_spill] sm:$0xff] }
 0x11a   : > { %596 = vmatpush.msra.mxu0 %v1975_v35  ;;  %967 = vmatpush.msra.mxu2 %v2609_v49  ;;  %v3968_v14 = vld [vmem:[#allocation124_spill] sm:$0xff]  ;;  %v3969_v24 = vld [vmem:[#allocation123_spill] sm:$0xff]  ;;  %v3970_v30 = vld [vmem:[#allocation125_spill] sm:$0xff] }
 0x11b   : > { %947 = vmatpush.msra.mxu1 %v3958_v25  ;;  %987 = vmatpush.msra.mxu3 %v3959_v16  ;;  %v3971_v27 = vld [vmem:[#allocation20_spill] sm:$0xff]  ;;  %v3972_v29 = vld [vmem:[#allocation121_spill] sm:$0xff]  ;;  %v3973_v26 = vld [vmem:[#allocation19_spill] sm:$0xff] }
 0x11c   : > { %597 = vmatpush.msra.mxu0 %v1970_v34  ;;  %968 = vmatpush.msra.mxu2 %v2589_v47  ;;  %v3974_v17 = vld [vmem:[#allocation118_spill] sm:$0xff]  ;;  %v3975_v21 = vld [vmem:[#allocation119_spill] sm:$0xff]  ;;  %v3978_v11 = vld [vmem:[#allocation116_spill] sm:$0xff]  ;;  %s943_s19 = scalar_lea.vmem %s4087_s6, %s3453_s20 }
 0x11d   : > { %948 = vmatpush.msra.mxu1 %v3960_v1  ;;  %988 = vmatpush.msra.mxu3 %v3961_v7  ;;  %v3976_v23 = vld [vmem:[#allocation18_spill] sm:$0xff]  ;;  %v3977_v5 = vld [vmem:[#allocation115_spill] sm:$0xff]  ;;  %v3979_v8 = vld [vmem:[#allocation17_spill] sm:$0xff]  ;;  %s1372_s26 = scalar_lea.vmem %s4160_s12, %s3453_s20 }
 0x11e   : > { %598 = vmatpush.msra.mxu0 %v3962_v33  ;;  %969 = vmatpush.msra.mxu2 %v2569_v60  ;;  %v3980_v2 = vld [vmem:[#allocation112_spill] sm:$0xff]  ;;  %v3981_v9 = vld [vmem:[#allocation111_spill] sm:$0xff]  ;;  %v3982_v10 = vld [vmem:[#allocation113_spill] sm:$0xff]  ;;  %s1354_s29 = scalar_lea.vmem %s4208_s28, %s3453_s20 }
 0x11f   : > { %949 = vmatpush.msra.mxu1 %v2564_v38  ;;  %989 = vmatpush.msra.mxu3 %v2574_v48  ;;  %v3983_v22 = vld [vmem:[#allocation16_spill] sm:$0xff]  ;;  %v3984_v3 = vld [vmem:[#allocation109_spill] sm:$0xff]  ;;  %v3985_v20 = vld [vmem:[#allocation15_spill] sm:$0xff] }
 0x120   : > { %599 = vmatpush.msra.mxu0 %v3963_v32  ;;  %970 = vmatpush.msra.mxu2 %v2549_v46  ;;  %v3986_v0 = vld [vmem:[#allocation105_spill] sm:$0xff]  ;;  %v3987_v12 = vld [vmem:[#allocation106_spill] sm:$0xff] }
 0x121   : > { %950 = vmatpush.msra.mxu1 %v2544_v51  ;;  %990 = vmatpush.msra.mxu3 %v3964_v4  ;;  %v3988_v19 = vld [vmem:[#allocation14_spill] sm:$0xff]  ;;  %v3991_v4 = vld [vmem:[#allocation103_spill] sm:$0xff]  ;;  %v3995_v7 = vld [vmem:[#allocation141_spill] sm:$0xff] }
 0x122   : > { %600 = vmatpush.msra.mxu0 %v3965_v31  ;;  %971 = vmatpush.msra.mxu2 %v2529_v54  ;;  %v3989_v1 = vld [vmem:[#allocation102_spill] sm:$0xff]  ;;  %v4155_v32 = vld [vmem:[#allocation149_spill] sm:$0xff] }
 0x123   : > { %951 = vmatpush.msra.mxu1 %v2524_v41  ;;  %991 = vmatpush.msra.mxu3 %v3966_v15  ;;  %v3993_v6 = vld [vmem:[#allocation98_spill] sm:$0xff] }
 0x124   : > { %601 = vmatpush.msra.mxu0 %v3967_v28  ;;  %972 = vmatpush.msra.mxu2 %v3968_v14  ;;  %v4156_v33 = vld [vmem:[#allocation142_spill] sm:$0xff] }
 0x125   : > { %952 = vmatpush.msra.mxu1 %v3969_v24  ;;  %992 = vmatpush.msra.mxu3 %v3970_v30  ;;  %v4153_v30 = vld [vmem:[#allocation146_spill] sm:$0xff] }
 0x126   : > { %602 = vmatpush.msra.mxu0 %v3971_v27  ;;  %973 = vmatpush.msra.mxu2 %v2489_v50 }
 0x127   : > { %953 = vmatpush.msra.mxu1 %v2484_v58  ;;  %993 = vmatpush.msra.mxu3 %v3972_v29 }
 0x128   : > { %603 = vmatpush.msra.mxu0 %v3973_v26  ;;  %974 = vmatpush.msra.mxu2 %v2469_v40 }
 0x129   : > { %954 = vmatpush.msra.mxu1 %v3974_v17  ;;  %994 = vmatpush.msra.mxu3 %v3975_v21 }
 0x12a   : > { %604 = vmatpush.msra.mxu0 %v3976_v23  ;;  %975 = vmatpush.msra.mxu2 %v2449_v44 }
 0x12b   : > { %955 = vmatpush.msra.mxu1 %v3977_v5  ;;  %995 = vmatpush.msra.mxu3 %v3978_v11  ;;  %v3992_v5 = vld [vmem:[#allocation13_spill] sm:$0xff] }
 0x12c   : > { %605 = vmatpush.msra.mxu0 %v3979_v8  ;;  %976 = vmatpush.msra.mxu2 %v3980_v2  ;;  %v3990_v2 = vld [vmem:[#allocation101_spill] sm:$0xff]  ;;  %v3997_v8 = vld [vmem:[#allocation90_spill] sm:$0xff] }
 0x12d   : > { %956 = vmatpush.msra.mxu1 %v3981_v9  ;;  %996 = vmatpush.msra.mxu3 %v3982_v10  ;;  %v3998_v9 = vld [vmem:[#allocation99_spill] sm:$0xff]  ;;  %v4004_v10 = vld [vmem:[#allocation89_spill] sm:$0xff] }
 0x12e   : > { %606 = vmatpush.msra.mxu0 %v3983_v22  ;;  %977 = vmatpush.msra.mxu2 %v2409_v45  ;;  %v1532_v22 = vmov 0  }
 0x12f   : > { %957 = vmatpush.msra.mxu1 %v2401_v62  ;;  %997 = vmatpush.msra.mxu3 %v3984_v3  ;;  %v3994_v3 = vld [vmem:[#allocation94_spill] sm:$0xff] }
 0x130   : > { %607 = vmatpush.msra.mxu0 %v3985_v20  ;;  %978 = vmatpush.msra.mxu2 %v2386_v57 }
 0x131   : > { %958 = vmatpush.msra.mxu1 %v3986_v0  ;;  %998 = vmatpush.msra.mxu3 %v3987_v12  ;;  %v3996_v0 = vld [vmem:[#allocation97_spill] sm:$0xff] }
 0x132   : > { %608 = vmatpush.msra.mxu0 %v3988_v19  ;;  %979 = vmatpush.msra.mxu2 %v3989_v1  ;;  %v3999_v1 = vld [vmem:[#allocation139_spill] sm:$0xff] }
 0x133   : > { %959 = vmatpush.msra.mxu1 %v3990_v2  ;;  %999 = vmatpush.msra.mxu3 %v3991_v4  ;;  %v4000_v2 = vld [vmem:[#allocation93_spill] sm:$0xff]  ;;  %v4001_v4 = vld [vmem:[#allocation86_spill] sm:$0xff] }
 0x134   : > { %609 = vmatpush.msra.mxu0 %v3992_v5  ;;  %980 = vmatpush.msra.mxu2 %v3993_v6  ;;  %v4002_v5 = vld [vmem:[#allocation95_spill] sm:$0xff]  ;;  %v4003_v6 = vld [vmem:[#allocation137_spill] sm:$0xff] }
 0x135   : > { %610 = vmatmul.f32.vlgmr.msra.gmra.mxu0 %v1525_v55  ;;  %960 = vmatpush.msra.mxu1 %v3996_v0  ;;  %v4007_v0 = vld [vmem:[#allocation134_spill] sm:$0xff] }
 0x136   : > { %1061 = vmatpush.msrb.mxu2 %v3994_v3  ;;  %1005 = vmatpush.msrb.mxu0 %v3995_v7  ;;  %v4005_v3 = vld [vmem:[#allocation81_spill] sm:$0xff]  ;;  %v4006_v7 = vld [vmem:[#allocation91_spill] sm:$0xff] }
 0x137   : > { %1000 = vmatpush.msra.mxu3 %v3998_v9  ;;  %1041 = vmatpush.msrb.mxu1 %v4000_v2  ;;  %v4009_v9 = vld [vmem:[#allocation77_spill] sm:$0xff]  ;;  %v4011_v2 = vld [vmem:[#allocation131_spill] sm:$0xff] }
 0x138   : > { %1062 = vmatpush.msrb.mxu2 %v3997_v8  ;;  %1006 = vmatpush.msrb.mxu0 %v3999_v1  ;;  %v4008_v8 = vld [vmem:[#allocation84_spill] sm:$0xff]  ;;  %v4010_v1 = vld [vmem:[#allocation87_spill] sm:$0xff] }
 0x139   : > { %1081 = vmatpush.msrb.mxu3 %v4002_v5  ;;  %1042 = vmatpush.msrb.mxu1 %v4004_v10  ;;  %v4013_v5 = vld [vmem:[#allocation73_spill] sm:$0xff]  ;;  %v4015_v10 = vld [vmem:[#allocation130_spill] sm:$0xff] }
 0x13a   : > { %1063 = vmatpush.msrb.mxu2 %v4001_v4  ;;  %1007 = vmatpush.msrb.mxu0 %v4003_v6  ;;  %v4012_v4 = vld [vmem:[#allocation80_spill] sm:$0xff]  ;;  %v4014_v6 = vld [vmem:[#allocation82_spill] sm:$0xff] }
 0x13b   : > { %1082 = vmatpush.msrb.mxu3 %v4006_v7  ;;  %1043 = vmatpush.msrb.mxu1 %v4008_v8  ;;  %v4017_v7 = vld [vmem:[#allocation69_spill] sm:$0xff]  ;;  %v4019_v8 = vld [vmem:[#allocation128_spill] sm:$0xff] }
 0x13c   : > { %1064 = vmatpush.msrb.mxu2 %v4005_v3  ;;  %1008 = vmatpush.msrb.mxu0 %v4007_v0  ;;  %v4016_v3 = vld [vmem:[#allocation76_spill] sm:$0xff]  ;;  %v4018_v0 = vld [vmem:[#allocation78_spill] sm:$0xff] }
 0x13d   : > { %1083 = vmatpush.msrb.mxu3 %v4010_v1  ;;  %1044 = vmatpush.msrb.mxu1 %v4012_v4  ;;  %v4021_v1 = vld [vmem:[#allocation65_spill] sm:$0xff]  ;;  %v4023_v4 = vld [vmem:[#allocation126_spill] sm:$0xff] }
 0x13e   : > { %1065 = vmatpush.msrb.mxu2 %v4009_v9  ;;  %1009 = vmatpush.msrb.mxu0 %v4011_v2  ;;  %v4020_v9 = vld [vmem:[#allocation72_spill] sm:$0xff]  ;;  %v4022_v2 = vld [vmem:[#allocation74_spill] sm:$0xff] }
 0x13f   : > { %1084 = vmatpush.msrb.mxu3 %v4014_v6  ;;  %1045 = vmatpush.msrb.mxu1 %v4016_v3  ;;  %v4025_v6 = vld [vmem:[#allocation61_spill] sm:$0xff]  ;;  %v4027_v3 = vld [vmem:[#allocation122_spill] sm:$0xff] }
 0x140   : > { %1066 = vmatpush.msrb.mxu2 %v4013_v5  ;;  %1010 = vmatpush.msrb.mxu0 %v4015_v10  ;;  %v4024_v5 = vld [vmem:[#allocation68_spill] sm:$0xff]  ;;  %v4026_v10 = vld [vmem:[#allocation70_spill] sm:$0xff] }
 0x141   : > { %1085 = vmatpush.msrb.mxu3 %v4018_v0  ;;  %1046 = vmatpush.msrb.mxu1 %v4020_v9  ;;  %v4029_v0 = vld [vmem:[#allocation55_spill] sm:$0xff]  ;;  %v4031_v9 = vld [vmem:[#allocation120_spill] sm:$0xff] }
 0x142   : > { %1067 = vmatpush.msrb.mxu2 %v4017_v7  ;;  %1011 = vmatpush.msrb.mxu0 %v4019_v8  ;;  %v4028_v7 = vld [vmem:[#allocation64_spill] sm:$0xff]  ;;  %v4030_v8 = vld [vmem:[#allocation66_spill] sm:$0xff] }
 0x143   : > { %1086 = vmatpush.msrb.mxu3 %v4022_v2  ;;  %1047 = vmatpush.msrb.mxu1 %v4024_v5  ;;  %v4033_v2 = vld [vmem:[#allocation51_spill] sm:$0xff]  ;;  %v4035_v5 = vld [vmem:[#allocation117_spill] sm:$0xff] }
 0x144   : > { %1068 = vmatpush.msrb.mxu2 %v4021_v1  ;;  %1012 = vmatpush.msrb.mxu0 %v4023_v4  ;;  %v4032_v1 = vld [vmem:[#allocation58_spill] sm:$0xff] }
 0x145   : > { %1087 = vmatpush.msrb.mxu3 %v4026_v10  ;;  %1048 = vmatpush.msrb.mxu1 %v4028_v7  ;;  %v4034_v4 = vld [vmem:[#allocation62_spill] sm:$0xff]  ;;  %v4037_v10 = vld [vmem:[#allocation47_spill] sm:$0xff] }
 0x146   : > { %1069 = vmatpush.msrb.mxu2 %v4025_v6  ;;  %1013 = vmatpush.msrb.mxu0 %v4027_v3  ;;  %v4036_v6 = vld [vmem:[#allocation54_spill] sm:$0xff]  ;;  %v4038_v3 = vld [vmem:[#allocation56_spill] sm:$0xff] }
 0x147   : > { %1088 = vmatpush.msrb.mxu3 %v4030_v8  ;;  %1049 = vmatpush.msrb.mxu1 %v4032_v1  ;;  %v4039_v7 = vld [vmem:[#allocation114_spill] sm:$0xff]  ;;  %v4041_v8 = vld [vmem:[#allocation43_spill] sm:$0xff] }
 0x148   : > { %1070 = vmatpush.msrb.mxu2 %v4029_v0  ;;  %1014 = vmatpush.msrb.mxu0 %v4031_v9  ;;  %v4040_v0 = vld [vmem:[#allocation50_spill] sm:$0xff]  ;;  %v4042_v9 = vld [vmem:[#allocation52_spill] sm:$0xff] }
 0x149   : > { %1089 = vmatpush.msrb.mxu3 %v4034_v4  ;;  %1050 = vmatpush.msrb.mxu1 %v4036_v6  ;;  %v4043_v1 = vld [vmem:[#allocation110_spill] sm:$0xff]  ;;  %v4045_v4 = vld [vmem:[#allocation39_spill] sm:$0xff] }
 0x14a   : > { %1071 = vmatpush.msrb.mxu2 %v4033_v2  ;;  %1015 = vmatpush.msrb.mxu0 %v4035_v5  ;;  %v4044_v2 = vld [vmem:[#allocation46_spill] sm:$0xff]  ;;  %v4046_v5 = vld [vmem:[#allocation48_spill] sm:$0xff]  ;;  %v4047_v6 = vld [vmem:[#allocation107_spill] sm:$0xff] }
 0x14b   : > { %1090 = vmatpush.msrb.mxu3 %v4038_v3  ;;  %1051 = vmatpush.msrb.mxu1 %v4040_v0  ;;  %v4049_v3 = vld [vmem:[#allocation35_spill] sm:$0xff]  ;;  %v4051_v0 = vld [vmem:[#allocation104_spill] sm:$0xff] }
 0x14c   : > { %1072 = vmatpush.msrb.mxu2 %v4037_v10  ;;  %1016 = vmatpush.msrb.mxu0 %v4039_v7  ;;  %v4048_v10 = vld [vmem:[#allocation42_spill] sm:$0xff]  ;;  %v4050_v7 = vld [vmem:[#allocation44_spill] sm:$0xff] }
 0x14d   : > { %1091 = vmatpush.msrb.mxu3 %v4042_v9  ;;  %1052 = vmatpush.msrb.mxu1 %v4044_v2  ;;  %v4053_v9 = vld [vmem:[#allocation29_spill] sm:$0xff]  ;;  %v4055_v2 = vld [vmem:[#allocation100_spill] sm:$0xff] }
 0x14e   : > { %1073 = vmatpush.msrb.mxu2 %v4041_v8  ;;  %1017 = vmatpush.msrb.mxu0 %v4043_v1  ;;  %v4052_v8 = vld [vmem:[#allocation38_spill] sm:$0xff]  ;;  %v4054_v1 = vld [vmem:[#allocation40_spill] sm:$0xff] }
 0x14f   : > { %1092 = vmatpush.msrb.mxu3 %v4046_v5  ;;  %1053 = vmatpush.msrb.mxu1 %v4048_v10  ;;  %v4057_v5 = vld [vmem:[#allocation96_spill] sm:$0xff] }
 0x150   : > { %1074 = vmatpush.msrb.mxu2 %v4045_v4  ;;  %1018 = vmatpush.msrb.mxu0 %v4047_v6  ;;  %v4056_v4 = vld [vmem:[#allocation32_spill] sm:$0xff] }
 0x151   : > { %1093 = vmatpush.msrb.mxu3 %v4050_v7  ;;  %1054 = vmatpush.msrb.mxu1 %v4052_v8  ;;  %v4058_v6 = vld [vmem:[#allocation36_spill] sm:$0xff]  ;;  %v4061_v7 = vld [vmem:[#allocation30_spill] sm:$0xff]  ;;  %v4063_v8 = vld [vmem:[#allocation83_spill] sm:$0xff] }
 0x152   : > { %1075 = vmatpush.msrb.mxu2 %v4049_v3  ;;  %1019 = vmatpush.msrb.mxu0 %v4051_v0  ;;  %v4059_v10 = vld [vmem:[#allocation28_spill] sm:$0xff] }
 0x153   : > { %1094 = vmatpush.msrb.mxu3 %v4054_v1  ;;  %1055 = vmatpush.msrb.mxu1 %v4056_v4  ;;  %v4060_v3 = vld [vmem:[#allocation92_spill] sm:$0xff]  ;;  %v4065_v1 = vld [vmem:[#allocation75_spill] sm:$0xff] }
 0x154   : > { %1076 = vmatpush.msrb.mxu2 %v4053_v9  ;;  %1020 = vmatpush.msrb.mxu0 %v4055_v2  ;;  %v4062_v0 = vld [vmem:[#allocation88_spill] sm:$0xff]  ;;  %v4064_v9 = vld [vmem:[#allocation79_spill] sm:$0xff] }
 0x155   : > { %1095 = vmatpush.msrb.mxu3 %v4058_v6  ;;  %1056 = vmatpush.msrb.mxu1 %v4059_v10  ;;  %v4066_v2 = vld [vmem:[#allocation71_spill] sm:$0xff]  ;;  %v4069_v6 = vld [vmem:[#allocation57_spill] sm:$0xff] }
 0x156   : > { %1101 = vmatpush.msra.mxu0 %v4057_v5  ;;  %v4067_v4 = vld [vmem:[#allocation67_spill] sm:$0xff]  ;;  %v4070_v10 = vld [vmem:[#allocation53_spill] sm:$0xff]  ;;  %1454 = vset.pattern.permute.xlu1 %v1532_v22 }
 0x157   : > { %1096 = vmatpush.msrb.mxu3 %v4061_v7  ;;  %v4068_v5 = vld [vmem:[#allocation63_spill] sm:$0xff]  ;;  %v4072_v7 = vld [vmem:[#allocation45_spill] sm:$0xff]  ;;  %1456 = vset.pattern.permute.xlu2 %v1532_v22 }
 0x158   : > { %1102 = vmatpush.msra.mxu0 %v4060_v3  ;;  %v4071_v3 = vld [vmem:[#allocation49_spill] sm:$0xff]  ;;  %1455 = vset.pattern.permute.xlu0 %v1532_v22 }
 0x15a   : > { %1103 = vmatpush.msra.mxu0 %v4062_v0  ;;  %v4073_v0 = vld [vmem:[#allocation41_spill] sm:$0xff] }
 0x15c   : > { %1104 = vmatpush.msra.mxu0 %v4063_v8  ;;  %v4074_v8 = vld [vmem:[#allocation37_spill] sm:$0xff] }
 0x15e   : > { %1105 = vmatpush.msra.mxu0 %v4064_v9  ;;  %v4075_v9 = vld [vmem:[#allocation31_spill] sm:$0xff] }
 0x160   : > { %1106 = vmatpush.msra.mxu0 %v4065_v1  ;;  %v4076_v1 = vld [vmem:[#allocation25_spill] sm:$0xff] }
 0x162   : > { %1107 = vmatpush.msra.mxu0 %v4066_v2  ;;  %v592_v2 = vperm.slane %v4076_v1, 0  ;;  %v4080_v1 = vld [vmem:[#allocation34_spill] sm:$0xff] }
 0x164   : > { %1108 = vmatpush.msra.mxu0 %v4067_v4 }
 0x166   : > { %1109 = vmatpush.msra.mxu0 %v4068_v5 }
 0x168   : > { %1110 = vmatpush.msra.mxu0 %v4069_v6 }
 0x16a   : > { %1111 = vmatpush.msra.mxu0 %v4070_v10  ;;  %v4077_v10 = vld [vmem:[#allocation12_spill] sm:$0xff] }
 0x16c   : > { %1112 = vmatpush.msra.mxu0 %v4071_v3 }
 0x16e   : > { %1113 = vmatpush.msra.mxu0 %v4072_v7 }
 0x170   : > { %1114 = vmatpush.msra.mxu0 %v4073_v0  ;;  %v4078_v0 = vld [vmem:[#allocation11_spill] sm:$0xff] }
 0x172   : > { %1115 = vmatpush.msra.mxu0 %v4074_v8  ;;  %v4079_v8 = vld [vmem:[#allocation60_spill] sm:$0xff] }
 0x174   : > { %1116 = vmatpush.msra.mxu0 %v4075_v9 }
 0x1b2   : > { %v611_v11 = vpop.f32.mrf.mxu0 }
 0x1b3   : > { %v612_v4 = vadd.f32 %v611_v11, %v592_v2  ;;  %v4081_v2 = vld [vmem:[#allocation26_spill] sm:$0xff] }
 0x1b4   : > { %v655_v21 = vperm.slane %v4081_v2, 0 }
 0x1b5   : > { %v622_v12 = vperm.slane %v612_v4, 0  ;;  %v617_v5 = vrot.slane %v612_v4, 3  ;;  %v616_v13 = vrot.slane %v612_v4, 2  ;;  %v615_v6 = vrot.slane %v612_v4, 1 }
 0x1b6   : > { %v618_v14 = vrot.slane %v612_v4, 4  ;;  %v619_v11 = vrot.slane %v612_v4, 5 }
 0x1b7   : > { %v638_v15 = vadd.f32 %v622_v12, %v4077_v10  ;;  %v625_v3 = vperm.slane %v617_v5, 0  ;;  %v624_v16 = vperm.slane %v616_v13, 0  ;;  %v623_v7 = vperm.slane %v615_v6, 0  ;;  %v4082_v12 = vld [vmem:[#allocation33_spill] sm:$0xff] }
 0x1b8   : > { %v626_v9 = vperm.slane %v618_v14, 0  ;;  %v620_v13 = vrot.slane %v612_v4, 6  ;;  %v627_v6 = vperm.slane %v619_v11, 0 }
 0x1b9   : > { %1457 = vtanh.f32 %v638_v15  ;;  %v641_v17 = vadd.f32 %v625_v3, %v4078_v0  ;;  %v640_v19 = vadd.f32 %v624_v16, %v4079_v8  ;;  %v639_v20 = vadd.f32 %v623_v7, %v4080_v1  ;;  %v4083_v0 = vld [vmem:[#allocation59_spill] sm:$0xff] }
 0x1ba   : > { %v642_v5 = vadd.f32 %v626_v9, %v4082_v12  ;;  %v628_v14 = vperm.slane %v620_v13, 0  ;;  %v621_v8 = vrot.slane %v612_v4, 7  ;;  %v4084_v9 = vld [vmem:[#allocation85_spill] sm:$0xff] }
 0x1bb   : > { %1459 = vtanh.f32 %v641_v17 }
 0x1bc   : > { %1461 = vtanh.f32 %v640_v19  ;;  %v643_v19 = vadd.f32 %v627_v6, %v4083_v0  ;;  %v644_v2 = vadd.f32 %v628_v14, %v4084_v9  ;;  %v4086_v14 = vld [vmem:[#allocation27_spill] sm:$0xff] }
 0x1bd   : > { %1463 = vtanh.f32 %v639_v20  ;;  %v629_v20 = vperm.slane %v621_v8, 0 }
 0x1be   : > { %1465 = vtanh.f32 %v642_v5  ;;  %v4085_v5 = vld [vmem:[#allocation108_spill] sm:$0xff] }
 0x1bf   : > { %v1458_v15 = vpop.eup %1457  ;;  %1467 = vtanh.f32 %v643_v19  ;;  %v645_v13 = vadd.f32 %v629_v20, %v4085_v5 }
 0x1c0   : > { %v657_v10 = vmul.f32 %v1458_v15, %v655_v21  ;;  %1469 = vtanh.f32 %v644_v2  ;;  %v703_v2 = vlaneseq }
 0x1c1   : > { %v1460_v16 = vpop.eup %1459  ;;  %1471 = vtanh.f32 %v645_v13 }
 0x1c2   : > { %v1462_v17 = vpop.eup %1461  ;;  %665 = vadd.xlane.f32.xlu0 %v657_v10  ;;  %v660_v3 = vmul.f32 %v1460_v16, %v655_v21 }
 0x1c3   : > { %v659_v7 = vmul.f32 %v1462_v17, %v655_v21  ;;  %v1464_v1 = vpop.eup %1463 }
 0x1c4   : > { %671 = vadd.xlane.f32.xlu2 %v660_v3  ;;  %v1466_v22 = vpop.eup %1465  ;;  %v658_v11 = vmul.f32 %v1464_v1, %v655_v21  ;;  %v682_v3 = vperm.slane %v4086_v14, 0 }
 0x1c5   : > { %669 = vadd.xlane.f32.xlu1 %v659_v7  ;;  %v661_v12 = vmul.f32 %v1466_v22, %v655_v21  ;;  %v1468_v15 = vpop.eup %1467  ;;  %v3414_v22 = vand.u32 127, %v703_v2 }
 0x1c6   : > { %v1470_v10 = vpop.eup %1469  ;;  %v662_v6 = vmul.f32 %v1468_v15, %v655_v21 }
 0x1c7   : > { %v663_v4 = vmul.f32 %v1470_v10, %v655_v21  ;;  %v1472_v16 = vpop.eup %1471 }
 0x1c8   : > { %v664_v17 = vmul.f32 %v1472_v16, %v655_v21 }
 0x1ca   : > { %667 = vadd.xlane.f32.xlu0 %v658_v11 }
 0x1cc   : > { %673 = vadd.xlane.f32.xlu2 %v661_v12 }
 0x1d2   : > { %675 = vadd.xlane.f32.xlu0 %v662_v6 }
 0x1d4   : > { %677 = vadd.xlane.f32.xlu2 %v663_v4 }
 0x1da   : > { %679 = vadd.xlane.f32.xlu0 %v664_v17 }
 0x1de   : > { %684 = vperm.xlu1 %1454, %v682_v3  }
 0x235   : > { %v666_v7 = vpop.xlane.xlu0 %665 }
 0x237   : > { %v672_v0 = vpop.xlane.xlu2 %671 }
 0x238   : > { %v670_v8 = vpop.xlane.xlu1 %669 }
 0x23d   : > { %v668_v19 = vpop.xlane.xlu0 %667 }
 0x23f   : > { %v674_v1 = vpop.xlane.xlu2 %673 }
 0x245   : > { %v676_v9 = vpop.xlane.xlu0 %675 }
 0x247   : > { %v678_v21 = vpop.xlane.xlu2 %677 }
 0x24d   : > { %v680_v17 = vpop.xlane.xlu0 %679 }
 0x250   : > { %v685_v20 = vpop.permute.xlu1 %684 }
 0x251   : > { %v687_v11 = vadd.f32 %v685_v20, %v666_v7  ;;  %v688_v12 = vadd.f32 %v685_v20, %v668_v19  ;;  %v689_v5 = vadd.f32 %v685_v20, %v670_v8  ;;  %v690_v13 = vadd.f32 %v685_v20, %v672_v0 }
 0x252   : > { %v691_v15 = vadd.f32 %v685_v20, %v674_v1  ;;  %v692_v10 = vadd.f32 %v685_v20, %v676_v9  ;;  %v693_v14 = vadd.f32 %v685_v20, %v678_v21  ;;  %v694_v3 = vadd.f32 %v685_v20, %v680_v17 }
 0x253   : > { %v705_v6 = vperm.slane %v687_v11, %v3414_v22  ;;  %v706_v4 = vperm.slane %v688_v12, %v3414_v22  ;;  %v707_v16 = vperm.slane %v689_v5, %v3414_v22  ;;  %v708_v2 = vperm.slane %v690_v13, %v3414_v22 }
 0x254   : > { %v709_v7 = vperm.slane %v691_v15, %v3414_v22  ;;  %v710_v19 = vperm.slane %v692_v10, %v3414_v22  ;;  %v711_v1 = vperm.slane %v693_v14, %v3414_v22  ;;  %v712_v24 = vperm.slane %v694_v3, %v3414_v22 }
 0x255   : > { %v713_v23 = vsel %vm174_vm1, %v706_v4, %v705_v6 }
 0x256   : > { %v714_v0 = vsel %vm176_vm2, %v707_v16, %v713_v23 }
 0x257   : > { %v715_v8 = vsel %vm178_vm3, %v708_v2, %v714_v0 }
 0x258   : > { %v716_v9 = vsel %vm180_vm4, %v709_v7, %v715_v8 }
 0x259   : > { %v717_v20 = vsel %vm182_vm5, %v710_v19, %v716_v9 }
 0x25a   : > { %v718_v21 = vsel %vm184_vm6, %v711_v1, %v717_v20 }
 0x25b   : > { %v719_v6 = vsel %vm186_vm7, %v712_v24, %v718_v21 }
 0x25c   : > { %v722_v4 = vsel %vm721_vm8, %v719_v6, -inf }
 0x25d   : > { %723 = vmax.xlane.f32.xlu2 %v722_v4 }
 0x2d0   : > { %v724_v23 = vpop.xlane.xlu2 %723 }
 0x2d1   : > { %v728_v16 = vperm.slane %v724_v23, 2  ;;  %v727_v17 = vperm.slane %v724_v23, 1  ;;  %v726_v2 = vperm.slane %v724_v23, 0  ;;  %v729_v7 = vperm.slane %v724_v23, 3 }
 0x2d2   : > { %v731_v8 = vperm.slane %v724_v23, 5  ;;  %v730_v20 = vperm.slane %v724_v23, 4  ;;  %v733_v6 = vperm.slane %v724_v23, 7 }
 0x2d3   : > { %v744_v0 = vsub.f32 %v689_v5, %v728_v16  ;;  %v743_v25 = vsub.f32 %v688_v12, %v727_v17  ;;  %v742_v26 = vsub.f32 %v687_v11, %v726_v2  ;;  %v745_v9 = vsub.f32 %v690_v13, %v729_v7 }
 0x2d4   : > { %v747_v1 = vsub.f32 %v692_v10, %v731_v8  ;;  %v746_v12 = vsub.f32 %v691_v15, %v730_v20 }
 0x2d5   : > { %v754_v27 = vmul.f32 1.442695, %v744_v0  ;;  %v752_v28 = vmul.f32 1.442695, %v743_v25  ;;  %v750_v19 = vmul.f32 1.442695, %v742_v26  ;;  %v749_v25 = vsub.f32 %v694_v3, %v733_v6 }
 0x2d6   : > { %v756_v24 = vmul.f32 1.442695, %v745_v9  ;;  %v760_v21 = vmul.f32 1.442695, %v747_v1  ;;  %v758_v26 = vmul.f32 1.442695, %v746_v12 }
 0x2d7   : > { %1473 = vpow2.f32 %v754_v27  ;;  %v732_v27 = vperm.slane %v724_v23, 6 }
 0x2d8   : > { %1475 = vpow2.f32 %v752_v28  ;;  %v764_v28 = vmul.f32 1.442695, %v749_v25 }
 0x2d9   : > { %1477 = vpow2.f32 %v750_v19  ;;  %v748_v10 = vsub.f32 %v693_v14, %v732_v27 }
 0x2da   : > { %1479 = vpow2.f32 %v756_v24 }
 0x2db   : > { %1481 = vpow2.f32 %v760_v21  ;;  %v762_v16 = vmul.f32 1.442695, %v748_v10 }
 0x2dc   : > { %1483 = vpow2.f32 %v758_v26 }
 0x2dd   : > { %v3432_v4 = vpop.eup %1473  ;;  %1485 = vpow2.f32 %v764_v28 }
 0x2de   : > { %v1476_v29 = vpop.eup %1475  ;;  %781 = vperm.xlu1 %1454, %v3432_v4   ;;  %1487 = vpow2.f32 %v762_v16 }
 0x2df   : > { %v1478_v11 = vpop.eup %1477  ;;  %778 = vperm.xlu2 %1456, %v1476_v29  }
 0x2e0   : > { %775 = vperm.xlu0 %1455, %v1478_v11   ;;  %v1480_v5 = vpop.eup %1479 }
 0x2e1   : > { %v1482_v13 = vpop.eup %1481 }
 0x2e2   : > { %v1484_v17 = vpop.eup %1483 }
 0x2e3   : > { %v1486_v2 = vpop.eup %1485 }
 0x2e4   : > { %v1488_v15 = vpop.eup %1487 }
 0x2e6   : > { %784 = vperm.xlu1 %1454, %v1480_v5  }
 0x2e7   : > { %790 = vperm.xlu2 %1456, %v1482_v13  }
 0x2ee   : > { %787 = vperm.xlu1 %1454, %v1484_v17  }
 0x2ef   : > { %796 = vperm.xlu2 %1456, %v1486_v2  }
 0x2f6   : > { %793 = vperm.xlu1 %1454, %v1488_v15  }
 0x339   : > { %v779_v3 = vpop.permute.xlu2 %778 }
 0x33a   : > { %v799_v9 = vperm.slane %v779_v3, %v3414_v22 }
 0x341   : > { %v791_v8 = vpop.permute.xlu2 %790 }
 0x342   : > { %v803_v27 = vperm.slane %v791_v8, %v3414_v22 }
 0x349   : > { %v797_v25 = vpop.permute.xlu2 %796 }
 0x34a   : > { %v805_v16 = vperm.slane %v797_v25, %v3414_v22 }
 0x350   : > { %v782_v0 = vpop.permute.xlu1 %781 }
 0x351   : > { %v800_v14 = vperm.slane %v782_v0, %v3414_v22 }
 0x352   : > { %v776_v23 = vpop.permute.xlu0 %775 }
 0x353   : > { %v798_v19 = vperm.slane %v776_v23, %v3414_v22 }
 0x355   : > { %v806_v24 = vsel %vm174_vm1, %v799_v9, %v798_v19 }
 0x356   : > { %v807_v6 = vsel %vm176_vm2, %v800_v14, %v806_v24 }
 0x358   : > { %v785_v7 = vpop.permute.xlu1 %784 }
 0x359   : > { %v801_v20 = vperm.slane %v785_v7, %v3414_v22 }
 0x35b   : > { %v808_v12 = vsel %vm178_vm3, %v801_v20, %v807_v6 }
 0x360   : > { %v788_v1 = vpop.permute.xlu1 %787 }
 0x361   : > { %v802_v21 = vperm.slane %v788_v1, %v3414_v22 }
 0x363   : > { %v809_v26 = vsel %vm180_vm4, %v802_v21, %v808_v12 }
 0x364   : > { %v810_v0 = vsel %vm182_vm5, %v803_v27, %v809_v26 }
 0x368   : > { %v794_v28 = vpop.permute.xlu1 %793 }
 0x369   : > { %v804_v10 = vperm.slane %v794_v28, %v3414_v22 }
 0x36b   : > { %v811_v3 = vsel %vm184_vm6, %v804_v10, %v810_v0 }
 0x36c   : > { %v812_v7 = vsel %vm186_vm7, %v805_v16, %v811_v3 }
 0x36d   : > { %v814_v23 = vsel %vm721_vm8, %v812_v7, 0.0 }
 0x36e   : > { %815 = vadd.xlane.f32.xlu1 %v814_v23  ;;  %v4092_v23 = vld [vmem:[#allocation205_spill] sm:$0xff] }
 0x3e1   : > { %v816_v19 = vpop.xlane.xlu1 %815 }
 0x3e2   : > { %1489 = vrcp.f32 %v816_v19 }
 0x3e8   : > { %v1490_v9 = vpop.eup %1489 }
 0x3e9   : > { %v818_v1 = vmul.f32 %v1490_v9, %v816_v19  ;;  %v4093_v19 = vld [vmem:[#allocation198_spill] sm:$0xff] }
 0x3eb   : > { %v819_v14 = vsub.f32 2.0, %v818_v1  ;;  %v4095_v1 = vld [vmem:[#allocation200_spill] sm:$0xff] }
 0x3ed   : > { %v820_v8 = vmul.f32 %v1490_v9, %v819_v14  ;;  %v4094_v9 = vld [vmem:[#allocation195_spill] sm:$0xff] }
 0x3ef   : > { %v823_v24 = vperm.slane %v820_v8, 1  ;;  %v822_v20 = vperm.slane %v820_v8, 0  ;;  %v825_v12 = vperm.slane %v820_v8, 3  ;;  %v824_v25 = vperm.slane %v820_v8, 2 }
 0x3f0   : > { %v827_v28 = vperm.slane %v820_v8, 5  ;;  %v826_v10 = vperm.slane %v820_v8, 4  ;;  %v829_v3 = vperm.slane %v820_v8, 7  ;;  %v828_v7 = vperm.slane %v820_v8, 6  ;;  %v4096_v8 = vld [vmem:[#allocation201_spill] sm:$0xff] }
 0x3f1   : > { %v839_v21 = vmul.f32 %v1476_v29, %v823_v24  ;;  %v838_v6 = vmul.f32 %v1478_v11, %v822_v20  ;;  %v841_v26 = vmul.f32 %v1480_v5, %v825_v12  ;;  %v840_v27 = vmul.f32 %v3432_v4, %v824_v25  ;;  %v3461_v4 = vld [vmem:[%s943_s19] sm:$0xff] }
 0x3f2   : > { %v843_v16 = vmul.f32 %v1482_v13, %v827_v28  ;;  %v842_v0 = vmul.f32 %v1484_v17, %v826_v10  ;;  %v845_v29 = vmul.f32 %v1486_v2, %v829_v3  ;;  %v844_v11 = vmul.f32 %v1488_v15, %v828_v7  ;;  %981 = vmatmul.f32.vlgmr.msra.gmra.mxu2 %v3461_v4  ;;  %v4088_v13 = vld [vmem:[#allocation203_spill] sm:$0xff]  ;;  %v4089_v17 = vld [vmem:[#allocation202_spill] sm:$0xff]  ;;  %v4091_v15 = vld [vmem:[#allocation204_spill] sm:$0xff] }
 0x3f3   : > { %853 = vperm.xlu2 %1456, %v839_v21   ;;  %848 = vperm.xlu0 %1455, %v838_v6   ;;  %v4090_v2 = vld [vmem:[#allocation199_spill] sm:$0xff]  ;;  %v4097_v24 = vld [vmem:[#allocation194_spill] sm:$0xff]  ;;  %v4099_v21 = vld [vmem:[#allocation196_spill] sm:$0xff] }
 0x3f4   : > { %961 = vmatmul.f32.vlgmr.msra.gmra.mxu1 %v3461_v4  ;;  %1141 = vmatpush.msra.mxu2 %v4088_v13  ;;  %v4098_v20 = vld [vmem:[#allocation191_spill] sm:$0xff]  ;;  %v4100_v6 = vld [vmem:[#allocation197_spill] sm:$0xff]  ;;  %v4101_v12 = vld [vmem:[#allocation190_spill] sm:$0xff] }
 0x3f5   : > { %1001 = vmatmul.f32.vlgmr.msra.gmra.mxu3 %v3461_v4  ;;  %1021 = vmatmul.f32.vlgmr.msrb.gmra.mxu0 %v3461_v4  ;;  %v4102_v25 = vld [vmem:[#allocation187_spill] sm:$0xff]  ;;  %v4105_v28 = vld [vmem:[#allocation186_spill] sm:$0xff] }
 0x3f6   : > { %1121 = vmatpush.msra.mxu1 %v4089_v17  ;;  %1142 = vmatpush.msra.mxu2 %v4090_v2  ;;  %v4106_v10 = vld [vmem:[#allocation183_spill] sm:$0xff]  ;;  %v4109_v3 = vld [vmem:[#allocation182_spill] sm:$0xff] }
 0x3f7   : > { %1161 = vmatpush.msra.mxu3 %v4091_v15  ;;  %1181 = vmatpush.msrb.mxu0 %v4092_v23  ;;  %v4110_v7 = vld [vmem:[#allocation179_spill] sm:$0xff]  ;;  %v4113_v13 = vld [vmem:[#allocation178_spill] sm:$0xff]  ;;  %v4115_v15 = vld [vmem:[#allocation180_spill] sm:$0xff] }
 0x3f8   : > { %1122 = vmatpush.msra.mxu1 %v4093_v19  ;;  %1143 = vmatpush.msra.mxu2 %v4094_v9  ;;  %v4114_v2 = vld [vmem:[#allocation175_spill] sm:$0xff]  ;;  %v4116_v19 = vld [vmem:[#allocation181_spill] sm:$0xff] }
 0x3f9   : > { %1162 = vmatpush.msra.mxu3 %v4095_v1  ;;  %1182 = vmatpush.msrb.mxu0 %v4096_v8  ;;  %v4117_v9 = vld [vmem:[#allocation5_spill] sm:$0xff]  ;;  %v4118_v8 = vld [vmem:[#allocation171_spill] sm:$0xff] }
 0x3fa   : > { %1123 = vmatpush.msra.mxu1 %v4097_v24  ;;  %1144 = vmatpush.msra.mxu2 %v4098_v20  ;;  %v4119_v24 = vld [vmem:[#allocation174_spill] sm:$0xff]  ;;  %v4120_v20 = vld [vmem:[#allocation176_spill] sm:$0xff] }
 0x3fb   : > { %863 = vperm.xlu2 %1456, %v841_v26   ;;  %858 = vperm.xlu0 %1455, %v840_v27   ;;  %v4103_v26 = vld [vmem:[#allocation192_spill] sm:$0xff]  ;;  %v4104_v27 = vld [vmem:[#allocation193_spill] sm:$0xff] }
 0x3fc   : > { %1163 = vmatpush.msra.mxu3 %v4099_v21  ;;  %1183 = vmatpush.msrb.mxu0 %v4100_v6  ;;  %v4121_v21 = vld [vmem:[#allocation177_spill] sm:$0xff]  ;;  %v4122_v6 = vld [vmem:[#allocation7_spill] sm:$0xff] }
 0x3fd   : > { %1124 = vmatpush.msra.mxu1 %v4101_v12  ;;  %1145 = vmatpush.msra.mxu2 %v4102_v25  ;;  %v4123_v25 = vld [vmem:[#allocation167_spill] sm:$0xff] }
 0x3fe   : > { %1164 = vmatpush.msra.mxu3 %v4103_v26  ;;  %1184 = vmatpush.msrb.mxu0 %v4104_v27  ;;  %v4124_v26 = vld [vmem:[#allocation170_spill] sm:$0xff]  ;;  %v4125_v27 = vld [vmem:[#allocation172_spill] sm:$0xff] }
 0x3ff   : > { %1125 = vmatpush.msra.mxu1 %v4105_v28  ;;  %1146 = vmatpush.msra.mxu2 %v4106_v10  ;;  %v4126_v28 = vld [vmem:[#allocation173_spill] sm:$0xff] }
 0x401   : > { %1126 = vmatpush.msra.mxu1 %v4109_v3  ;;  %1147 = vmatpush.msra.mxu2 %v4110_v7  ;;  %v4129_v3 = vld [vmem:[#allocation168_spill] sm:$0xff]  ;;  %v4130_v7 = vld [vmem:[#allocation169_spill] sm:$0xff] }
 0x403   : > { %873 = vperm.xlu2 %1456, %v843_v16   ;;  %868 = vperm.xlu0 %1455, %v842_v0   ;;  %v4107_v16 = vld [vmem:[#allocation188_spill] sm:$0xff]  ;;  %v4108_v0 = vld [vmem:[#allocation189_spill] sm:$0xff] }
 0x404   : > { %1165 = vmatpush.msra.mxu3 %v4107_v16  ;;  %1185 = vmatpush.msrb.mxu0 %v4108_v0  ;;  %v4127_v16 = vld [vmem:[#allocation163_spill] sm:$0xff]  ;;  %v4128_v0 = vld [vmem:[#allocation166_spill] sm:$0xff] }
 0x405   : > { %1127 = vmatpush.msra.mxu1 %v4113_v13  ;;  %1148 = vmatpush.msra.mxu2 %v4114_v2 }
 0x407   : > { %1149 = vmatpush.msra.mxu2 %v4118_v8  ;;  %1128 = vmatpush.msra.mxu1 %v4119_v24  ;;  %v4135_v24 = vld [vmem:[#allocation164_spill] sm:$0xff] }
 0x409   : > { %1150 = vmatpush.msra.mxu2 %v4123_v25  ;;  %1129 = vmatpush.msra.mxu1 %v4124_v26 }
 0x40b   : > { %883 = vperm.xlu2 %1456, %v845_v29   ;;  %878 = vperm.xlu0 %1455, %v844_v11   ;;  %v4111_v29 = vld [vmem:[#allocation184_spill] sm:$0xff]  ;;  %v4112_v11 = vld [vmem:[#allocation185_spill] sm:$0xff] }
 0x40c   : > { %1166 = vmatpush.msra.mxu3 %v4111_v29  ;;  %1186 = vmatpush.msrb.mxu0 %v4112_v11  ;;  %v4131_v11 = vld [vmem:[#allocation3_spill] sm:$0xff] }
 0x40d   : > { %1151 = vmatpush.msra.mxu2 %v4127_v16  ;;  %1130 = vmatpush.msra.mxu1 %v4128_v0 }
 0x40e   : > { %1167 = vmatpush.msra.mxu3 %v4115_v15  ;;  %1187 = vmatpush.msrb.mxu0 %v4116_v19  ;;  %v4132_v15 = vld [vmem:[#allocation159_spill] sm:$0xff]  ;;  %v4133_v19 = vld [vmem:[#allocation162_spill] sm:$0xff] }
 0x40f   : > { %1152 = vmatpush.msra.mxu2 %v4132_v15  ;;  %1131 = vmatpush.msra.mxu1 %v4133_v19  ;;  %v4142_v15 = vld [vmem:[#allocation161_spill] sm:$0xff]  ;;  %v4144_v19 = vld [vmem:[#allocation156_spill] sm:$0xff] }
 0x410   : > { %1168 = vmatpush.msra.mxu3 %v4120_v20  ;;  %1188 = vmatpush.msrb.mxu0 %v4121_v21  ;;  %v4136_v21 = vld [vmem:[#allocation155_spill] sm:$0xff] }
 0x411   : > { %1153 = vmatpush.msra.mxu2 %v4136_v21 }
 0x412   : > { %1169 = vmatpush.msra.mxu3 %v4125_v27  ;;  %1189 = vmatpush.msrb.mxu0 %v4126_v28  ;;  %v4138_v27 = vld [vmem:[#allocation158_spill] sm:$0xff]  ;;  %v4139_v28 = vld [vmem:[#allocation160_spill] sm:$0xff] }
 0x413   : > { %1132 = vmatpush.msra.mxu1 %v4138_v27 }
 0x414   : > { %1170 = vmatpush.msra.mxu3 %v4129_v3  ;;  %1190 = vmatpush.msrb.mxu0 %v4130_v7  ;;  %v4140_v3 = vld [vmem:[#allocation6_spill] sm:$0xff] }
 0x416   : > { %1171 = vmatpush.msra.mxu3 %v4135_v24 }
 0x418   : > { %1172 = vmatpush.msra.mxu3 %v4139_v28 }
 0x41a   : > { %1173 = vmatpush.msra.mxu3 %v4144_v19 }
 0x44d   : > { %v3455_v5 = vpop.permute.xlu2 %853 }
 0x44e   : > { %v887_v12 = vmul.f32 %v3455_v5, %v4122_v6  ;;  %v4137_v6 = vld [vmem:[#allocation165_spill] sm:$0xff] }
 0x44f   : > { %1191 = vmatpush.msrb.mxu0 %v4137_v6  ;;  %v4147_v6 = vld [vmem:[#allocation157_spill] sm:$0xff] }
 0x450   : > { %v900_v29 = vrot.slane %v887_v12, 4 }
 0x451   : > { %1192 = vmatpush.msrb.mxu0 %v4142_v15 }
 0x452   : > { %v901_v16 = vadd.f32 %v900_v29, %v887_v12  ;;  %v4146_v29 = vld [vmem:[#allocation147_spill] sm:$0xff] }
 0x453   : > { %1193 = vmatpush.msrb.mxu0 %v4147_v6 }
 0x455   : > { %v3475_v14 = vpop.permute.xlu2 %863 }
 0x456   : > { %v889_v13 = vmul.f32 %v3475_v14, %v4131_v11  ;;  %v4141_v11 = vld [vmem:[#allocation151_spill] sm:$0xff] }
 0x457   : > { %1154 = vmatpush.msra.mxu2 %v4141_v11  ;;  %v1357_v11 = vperm.slane %v3455_v5, %v3414_v22 }
 0x458   : > { %v912_v0 = vrot.slane %v889_v13, 4 }
 0x459   : > { %1155 = vmatpush.msra.mxu2 %v4146_v29  ;;  %v4152_v29 = vld [vmem:[#allocation4_spill] sm:$0xff] }
 0x45a   : > { %v913_v15 = vadd.f32 %v912_v0, %v889_v13 }
 0x45d   : > { %v3499_v23 = vpop.permute.xlu2 %873 }
 0x45e   : > { %v891_v7 = vmul.f32 %v3499_v23, %v4140_v3  ;;  %v4148_v3 = vld [vmem:[#allocation150_spill] sm:$0xff] }
 0x465   : > { %v3495_v17 = vpop.permute.xlu0 %848  ;;  %v3526_v25 = vpop.permute.xlu2 %883 }
 0x466   : > { %v886_v1 = vmul.f32 %v3495_v17, %v4117_v9  ;;  %v4134_v9 = vld [vmem:[#allocation8_spill] sm:$0xff]  ;;  %v1356_v12 = vperm.slane %v3495_v17, %v3414_v22  ;;  %v4151_v17 = vld [vmem:[#allocation153_spill] sm:$0xff] }
 0x467   : > { %1194 = vmatpush.msrb.mxu0 %v4151_v17  ;;  %v4157_v17 = vld [vmem:[#allocation144_spill] sm:$0xff] }
 0x468   : > { %v894_v10 = vrot.slane %v886_v1, 4 }
 0x469   : > { %1195 = vmatpush.msrb.mxu0 %v4155_v32 }
 0x46a   : > { %v895_v20 = vadd.f32 %v894_v10, %v886_v1  ;;  %v4143_v10 = vld [vmem:[#allocation154_spill] sm:$0xff] }
 0x46b   : > { %1133 = vmatpush.msra.mxu1 %v4143_v10  ;;  %v924_v10 = vrot.slane %v891_v7, 4 }
 0x46c   : > { %v896_v21 = vrot.slane %v895_v20, 2 }
 0x46d   : > { %v859_v2 = vpop.permute.xlu0 %858  ;;  %1134 = vmatpush.msra.mxu1 %v4148_v3 }
 0x46e   : > { %v888_v8 = vmul.f32 %v859_v2, %v4134_v9  ;;  %v4145_v9 = vld [vmem:[#allocation10_spill] sm:$0xff]  ;;  %v1358_v28 = vperm.slane %v859_v2, %v3414_v22  ;;  %v4154_v2 = vld [vmem:[#allocation148_spill] sm:$0xff]  ;;  %v897_v31 = vadd.f32 %v896_v21, %v895_v20  ;;  %v925_v20 = vadd.f32 %v924_v10, %v891_v7  ;;  %v4158_v21 = vld [vmem:[#allocation145_spill] sm:$0xff] }
 0x46f   : > { %v893_v24 = vmul.f32 %v3526_v25, %v4145_v9  ;;  %v4150_v9 = vld [vmem:[#allocation143_spill] sm:$0xff]  ;;  %1135 = vmatpush.msra.mxu1 %v4153_v30  ;;  %v914_v30 = vrot.slane %v913_v15, 2  ;;  %1196 = vmatpush.msrb.mxu0 %v4158_v21  ;;  %v4159_v10 = vld [vmem:[#allocation9_spill] sm:$0xff] }
 0x470   : > { %v906_v26 = vrot.slane %v888_v8, 4  ;;  %1156 = vmatpush.msra.mxu2 %v4150_v9 }
 0x471   : > { %v936_v3 = vrot.slane %v893_v24, 4  ;;  %1136 = vmatpush.msra.mxu1 %v4156_v33 }
 0x472   : > { %v907_v1 = vadd.f32 %v906_v26, %v888_v8  ;;  %v4149_v8 = vld [vmem:[#allocation152_spill] sm:$0xff]  ;;  %v902_v26 = vrot.slane %v901_v16, 2 }
 0x473   : > { %1174 = vmatpush.msra.mxu3 %v4149_v8  ;;  %v1364_v8 = vsel %vm174_vm1, %v1357_v11, %v1356_v12  ;;  %v937_v32 = vadd.f32 %v936_v3, %v893_v24  ;;  %v1363_v3 = vperm.slane %v3526_v25, %v3414_v22 }
 0x474   : > { %v908_v27 = vrot.slane %v907_v1, 2  ;;  %v1365_v13 = vsel %vm176_vm2, %v1358_v28, %v1364_v8  ;;  %v915_v8 = vadd.f32 %v914_v30, %v913_v15 }
 0x475   : > { %v869_v19 = vpop.permute.xlu0 %868  ;;  %1175 = vmatpush.msra.mxu3 %v4154_v2  ;;  %v1359_v2 = vperm.slane %v3475_v14, %v3414_v22 }
 0x476   : > { %v890_v6 = vmul.f32 %v869_v19, %v4152_v29  ;;  %v909_v5 = vadd.f32 %v908_v27, %v907_v1  ;;  %v1360_v9 = vperm.slane %v869_v19, %v3414_v22  ;;  %v903_v29 = vadd.f32 %v902_v26, %v901_v16 }
 0x477   : > { %1176 = vmatpush.msra.mxu3 %v4157_v17  ;;  %v898_v1 = vrot.slane %v897_v31, 1  ;;  %v1366_v27 = vsel %vm178_vm3, %v1359_v2, %v1365_v13  ;;  %v926_v16 = vrot.slane %v925_v20, 2  ;;  %v1361_v26 = vperm.slane %v3499_v23, %v3414_v22 }
 0x478   : > { %v918_v0 = vrot.slane %v890_v6, 4  ;;  %v910_v28 = vrot.slane %v909_v5, 1  ;;  %v1367_v33 = vsel %vm180_vm4, %v1360_v9, %v1366_v27  ;;  %v904_v19 = vrot.slane %v903_v29, 1 }
 0x479   : > { %v899_v13 = vadd.f32 %v898_v1, %v897_v31  ;;  %v916_v21 = vrot.slane %v915_v8, 1 }
 0x47a   : > { %v919_v12 = vadd.f32 %v918_v0, %v890_v6  ;;  %v938_v6 = vrot.slane %v937_v32, 2  ;;  %v1368_v0 = vsel %vm182_vm5, %v1361_v26, %v1367_v33  ;;  %v911_v15 = vadd.f32 %v910_v28, %v909_v5 }
 0x47b   : > { %v905_v2 = vadd.f32 %v904_v19, %v903_v29  ;;  %v917_v5 = vadd.f32 %v916_v21, %v915_v8  ;;  %v4161_v8 = vld [vmem:[#allocation239_spill] sm:$0xff]  ;;  %v4171_v21 = vld [vmem:[#allocation218_spill] sm:$0xff] }
 0x47c   : > { %v920_v11 = vrot.slane %v919_v12, 2  ;;  %v939_v31 = vadd.f32 %v938_v6, %v937_v32 }
 0x47d   : > { %v879_v14 = vpop.permute.xlu0 %878 }
 0x47e   : > { %v921_v7 = vadd.f32 %v920_v11, %v919_v12  ;;  %v892_v17 = vmul.f32 %v879_v14, %v4159_v10  ;;  %v1362_v24 = vperm.slane %v879_v14, %v3414_v22  ;;  %v927_v12 = vadd.f32 %v926_v16, %v925_v20 }
 0x47f   : > { %v1033_v22 = vsel %vm174_vm1, %v905_v2, %v899_v13  ;;  %v940_v14 = vrot.slane %v939_v31, 1  ;;  %v4164_v13 = vld [vmem:[#allocation221_spill] sm:$0xff]  ;;  %v4170_v2 = vld [vmem:[#allocation234_spill] sm:$0xff] }
 0x480   : > { %v922_v9 = vrot.slane %v921_v7, 1  ;;  %v930_v23 = vrot.slane %v892_v17, 4  ;;  %v1369_v30 = vsel %vm184_vm6, %v1362_v24, %v1368_v0  ;;  %v1034_v25 = vsel %vm176_vm2, %v911_v15, %v1033_v22  ;;  %v4165_v0 = vld [vmem:[#allocation237_spill] sm:$0xff]  ;;  %v4166_v15 = vld [vmem:[#allocation220_spill] sm:$0xff] }
 0x481   : > { %v1370_v27 = vsel %vm186_vm7, %v1363_v3, %v1369_v30  ;;  %v928_v28 = vrot.slane %v927_v12, 1  ;;  %v1035_v29 = vsel %vm178_vm3, %v917_v5, %v1034_v25  ;;  %v4163_v3 = vld [vmem:[#allocation238_spill] sm:$0xff]  ;;  %v4169_v30 = vld [vmem:[#allocation219_spill] sm:$0xff]  ;;  %v4176_v22 = vld [vmem:[#allocation232_spill] sm:$0xff] }
 0x482   : > { %v931_v11 = vadd.f32 %v930_v23, %v892_v17  ;;  %1373 = vst.msk [vmem:[%s1372_s26] sm:$0xff] %vm721_vm8, %v1370_v27  ;;  %v923_v1 = vadd.f32 %v922_v9, %v921_v7  ;;  %v941_v17 = vadd.f32 %v940_v14, %v939_v31  ;;  %v4162_v7 = vld [vmem:[#allocation222_spill] sm:$0xff]  ;;  %v4167_v9 = vld [vmem:[#allocation236_spill] sm:$0xff]  ;;  %v4168_v23 = vld [vmem:[#allocation235_spill] sm:$0xff] }
 0x483   : > { %v929_v16 = vadd.f32 %v928_v28, %v927_v12  ;;  %v4172_v12 = vld [vmem:[#allocation252_spill] sm:$0xff]  ;;  %v4173_v27 = vld [vmem:[#allocation233_spill] sm:$0xff]  ;;  %v4175_v31 = vld [vmem:[#allocation251_spill] sm:$0xff] }
 0x484   : > { %v932_v33 = vrot.slane %v931_v11, 2  ;;  %v1036_v20 = vsel %vm180_vm4, %v923_v1, %v1035_v29  ;;  %v4178_v25 = vld [vmem:[#allocation250_spill] sm:$0xff]  ;;  %v4179_v1 = vld [vmem:[#allocation231_spill] sm:$0xff]  ;;  %v4181_v5 = vld [vmem:[#allocation249_spill] sm:$0xff] }
 0x485   : > { %v1037_v32 = vsel %vm182_vm5, %v929_v16, %v1036_v20  ;;  %v4182_v28 = vld [vmem:[#allocation230_spill] sm:$0xff]  ;;  %v4184_v14 = vld [vmem:[#allocation248_spill] sm:$0xff]  ;;  %v4185_v29 = vld [vmem:[#allocation229_spill] sm:$0xff] }
 0x486   : > { %v933_v26 = vadd.f32 %v932_v33, %v931_v11  ;;  %v4174_v11 = vld [vmem:[#allocation217_spill] sm:$0xff]  ;;  %v4180_v33 = vld [vmem:[#allocation215_spill] sm:$0xff]  ;;  %v4188_v16 = vld [vmem:[#allocation228_spill] sm:$0xff] }
 0x487   : > { %v4187_v20 = vld [vmem:[#allocation247_spill] sm:$0xff] }
 0x488   : > { %v934_v19 = vrot.slane %v933_v26, 1 }
 0x48a   : > { %v935_v10 = vadd.f32 %v934_v19, %v933_v26  ;;  %v4183_v26 = vld [vmem:[#allocation214_spill] sm:$0xff]  ;;  %v4186_v19 = vld [vmem:[#allocation213_spill] sm:$0xff] }
 0x48c   : > { %v1038_v24 = vsel %vm184_vm6, %v935_v10, %v1037_v32  ;;  %v4189_v10 = vld [vmem:[#allocation212_spill] sm:$0xff]  ;;  %v4191_v32 = vld [vmem:[#allocation227_spill] sm:$0xff] }
 0x48d   : > { %v1039_v6 = vsel %vm186_vm7, %v941_v17, %v1038_v24  ;;  %v4190_v17 = vld [vmem:[#allocation246_spill] sm:$0xff]  ;;  %v4192_v24 = vld [vmem:[#allocation211_spill] sm:$0xff] }
 0x48e   : > { %1057 = vmatmul.f32.vlgmr.msrb.gmra.mxu1 %v1039_v6  ;;  %1077 = vmatmul.f32.vlgmr.msrb.gmra.mxu2 %v1039_v6 }
 0x48f   : > { %1097 = vmatmul.f32.vlgmr.msrb.gmra.mxu3 %v1039_v6  ;;  %1117 = vmatmul.f32.vlgmr.msra.gmra.mxu0 %v1039_v6 }
 0x490   : > { %1306 = vmatpush.msrb.mxu2 %v4161_v8  ;;  %1281 = vmatpush.msrb.mxu1 %v4162_v7  ;;  %v4193_v8 = vld [vmem:[#allocation245_spill] sm:$0xff]  ;;  %v4194_v7 = vld [vmem:[#allocation226_spill] sm:$0xff] }
 0x491   : > { %1334 = vmatpush.msrb.mxu3 %v3234_v18 }
 0x492   : > { %1307 = vmatpush.msrb.mxu2 %v4163_v3  ;;  %1282 = vmatpush.msrb.mxu1 %v4164_v13  ;;  %v4195_v3 = vld [vmem:[#allocation210_spill] sm:$0xff]  ;;  %v4196_v13 = vld [vmem:[#allocation244_spill] sm:$0xff] }
 0x493   : > { %1335 = vmatpush.msrb.mxu3 %v3229_v52 }
 0x494   : > { %1308 = vmatpush.msrb.mxu2 %v4165_v0  ;;  %1283 = vmatpush.msrb.mxu1 %v4166_v15  ;;  %v4197_v0 = vld [vmem:[#allocation225_spill] sm:$0xff] }
 0x495   : > { %1336 = vmatpush.msrb.mxu3 %v3224_v59  ;;  %v4198_v15 = vld [vmem:[#allocation209_spill] sm:$0xff] }
 0x496   : > { %1309 = vmatpush.msrb.mxu2 %v4167_v9  ;;  %1137 = vmatmul.f32.vlgmr.msra.gmra.mxu1 %v1525_v55  ;;  %v4199_v9 = vld [vmem:[#allocation243_spill] sm:$0xff] }
 0x497   : > { %1157 = vmatmul.f32.vlgmr.msra.gmra.mxu2 %v1525_v55  ;;  %1177 = vmatmul.f32.vlgmr.msra.gmra.mxu3 %v1525_v55 }
 0x498   : > { %1197 = vmatmul.f32.vlgmr.msrb.gmra.mxu0 %v1525_v55  ;;  %1310 = vmatpush.msrb.mxu2 %v4168_v23  ;;  %v4177_v55 = vld [vmem:[#allocation216_spill] sm:$0xff] }
 0x499   : > { %1284 = vmatpush.msrb.mxu1 %v4169_v30  ;;  %1337 = vmatpush.msrb.mxu3 %v3219_v61  ;;  %v4200_v23 = vld [vmem:[#allocation224_spill] sm:$0xff] }
 0x49a   : > { %1311 = vmatpush.msrb.mxu2 %v4170_v2  ;;  %v4201_v30 = vld [vmem:[#allocation208_spill] sm:$0xff]  ;;  %v4202_v2 = vld [vmem:[#allocation242_spill] sm:$0xff] }
 0x49b   : > { %1285 = vmatpush.msrb.mxu1 %v4171_v21  ;;  %1338 = vmatpush.msrb.mxu3 %v4172_v12  ;;  %v4203_v21 = vld [vmem:[#allocation207_spill] sm:$0xff]  ;;  %v4204_v12 = vld [vmem:[#allocation241_spill] sm:$0xff] }
 0x49c   : > { %1312 = vmatpush.msrb.mxu2 %v4173_v27  ;;  %v1022_v27 = vpop.f32.mrf.mxu0 }
 0x49d   : > { %1286 = vmatpush.msrb.mxu1 %v4174_v11  ;;  %1339 = vmatpush.msrb.mxu3 %v4175_v31  ;;  %v962_v11 = vpop.f32.mrf.mxu1  ;;  %v982_v31 = vpop.f32.mrf.mxu2 }
 0x49e   : > { %1313 = vmatpush.msrb.mxu2 %v4176_v22 }
 0x49f   : > { %1287 = vmatpush.msrb.mxu1 %v4177_v55  ;;  %1340 = vmatpush.msrb.mxu3 %v4178_v25 }
 0x4a0   : > { %1314 = vmatpush.msrb.mxu2 %v4179_v1 }
 0x4a1   : > { %1288 = vmatpush.msrb.mxu1 %v4180_v33  ;;  %1341 = vmatpush.msrb.mxu3 %v4181_v5  ;;  %v4205_v33 = vld [vmem:[#allocation206_spill] sm:$0xff] }
 0x4a2   : > { %1315 = vmatpush.msrb.mxu2 %v4182_v28  ;;  %v1206_v5 = vperm.slane %v4205_v33, 0 }
 0x4a3   : > { %1289 = vmatpush.msrb.mxu1 %v4183_v26  ;;  %1342 = vmatpush.msrb.mxu3 %v4184_v14  ;;  %v1209_v14 = vperm.slane %v4205_v33, 3 }
 0x4a4   : > { %1316 = vmatpush.msrb.mxu2 %v4185_v29  ;;  %v1002_v29 = vpop.f32.mrf.mxu3 }
 0x4a5   : > { %1290 = vmatpush.msrb.mxu1 %v4186_v19  ;;  %1343 = vmatpush.msrb.mxu3 %v4187_v20 }
 0x4a6   : > { %1317 = vmatpush.msrb.mxu2 %v4188_v16 }
 0x4a7   : > { %1291 = vmatpush.msrb.mxu1 %v4189_v10  ;;  %1344 = vmatpush.msrb.mxu3 %v4190_v17 }
 0x4a8   : > { %1318 = vmatpush.msrb.mxu2 %v4191_v32 }
 0x4a9   : > { %1292 = vmatpush.msrb.mxu1 %v4192_v24  ;;  %1345 = vmatpush.msrb.mxu3 %v4193_v8  ;;  %v1207_v24 = vperm.slane %v4205_v33, 1 }
 0x4aa   : > { %1319 = vmatpush.msrb.mxu2 %v4194_v7 }
 0x4ab   : > { %1293 = vmatpush.msrb.mxu1 %v4195_v3  ;;  %1346 = vmatpush.msrb.mxu3 %v4196_v13 }
 0x4ac   : > { %1320 = vmatpush.msrb.mxu2 %v4197_v0 }
 0x4ad   : > { %1294 = vmatpush.msrb.mxu1 %v4198_v15  ;;  %1347 = vmatpush.msrb.mxu3 %v4199_v9 }
 0x4ae   : > { %1321 = vmatpush.msrb.mxu2 %v4200_v23 }
 0x4af   : > { %1322 = vmatmul.f32.vlgmr.msrb.gmra.mxu2 %v1039_v6  ;;  %1295 = vmatpush.msrb.mxu1 %v4201_v30 }
 0x4b0   : > { %1348 = vmatpush.msrb.mxu3 %v4202_v2 }
 0x4b1   : > { %1296 = vmatpush.msrb.mxu1 %v4203_v21 }
 0x4b2   : > { %1349 = vmatpush.msrb.mxu3 %v4204_v12 }
 0x50b   : > { %v1058_v22 = vpop.f32.mrf.mxu1 }
 0x50c   : > { %v1118_v55 = vpop.f32.mrf.mxu0  ;;  %v1059_v1 = vadd.f32 %v1058_v22, %v962_v11 }
 0x50d   : > { %v1119_v26 = vadd.f32 %v1118_v55, %v1022_v27 }
 0x511   : > { %v1078_v25 = vpop.f32.mrf.mxu2 }
 0x512   : > { %v1079_v32 = vadd.f32 %v1078_v25, %v982_v31  ;;  %v1098_v0 = vpop.f32.mrf.mxu3 }
 0x513   : > { %v1138_v28 = vpop.f32.mrf.mxu1  ;;  %v1099_v31 = vadd.f32 %v1098_v0, %v1002_v29 }
 0x514   : > { %v1201_v6 = vadd.f32 %v1138_v28, %v1059_v1  ;;  %v1208_v1 = vperm.slane %v4205_v33, 2 }
 0x515   : > { %v1198_v19 = vpop.f32.mrf.mxu0 }
 0x516   : > { %v1214_v20 = vadd.f32 %v1206_v5, %v1201_v6  ;;  %v1204_v16 = vadd.f32 %v1198_v19, %v1119_v26 }
 0x518   : > { %v1400_v10 = vmul.f32 -1.442695, %v1214_v20  ;;  %v1217_v17 = vadd.f32 %v1209_v14, %v1204_v16 }
 0x51a   : > { %1491 = vpow2.f32 %v1400_v10  ;;  %v1402_v8 = vmul.f32 -1.442695, %v1217_v17  ;;  %v1158_v7 = vpop.f32.mrf.mxu2  ;;  %v1178_v11 = vpop.f32.mrf.mxu3 }
 0x51b   : > { %v1202_v3 = vadd.f32 %v1158_v7, %v1079_v32  ;;  %v1203_v25 = vadd.f32 %v1178_v11, %v1099_v31 }
 0x51c   : > { %1493 = vpow2.f32 %v1402_v8 }
 0x51d   : > { %v1215_v13 = vadd.f32 %v1207_v24, %v1202_v3  ;;  %v1216_v6 = vadd.f32 %v1208_v1, %v1203_v25 }
 0x51f   : > { %v1401_v15 = vmul.f32 -1.442695, %v1215_v13 }
 0x520   : > { %v1492_v9 = vpop.eup %1491 }
 0x521   : > { %v1221_v23 = vadd.f32 1.0, %v1492_v9  ;;  %1495 = vpow2.f32 %v1401_v15 }
 0x522   : > { %v1494_v30 = vpop.eup %1493 }
 0x523   : > { %1497 = vrcp.f32 %v1221_v23  ;;  %v1260_v2 = vadd.f32 1.0, %v1494_v30  ;;  %v1233_v16 = vand.u32 2147483648, %v1221_v23  ;;  %vm1227_vm10 = vweird.f32 %v1221_v23 }
 0x524   : > { %v1231_v17 = vand.u32 2147483647, %v1221_v23 }
 0x525   : > { %1499 = vrcp.f32 %v1260_v2  ;;  %v1234_v3 = vor.u32 1.1754944e-38, %v1233_v16  ;;  %v4207_v16 = vld [vmem:[#allocation240_spill] sm:$0xff] }
 0x526   : > { %vm1232_vm14 = vcmp.eq.f32.partialorder %v1231_v17, 8.507059e+37 }
 0x527   : > { %v1496_v21 = vpop.eup %1495 }
 0x528   : > { %v1240_v12 = vadd.f32 1.0, %v1496_v21 }
 0x529   : > { %v1498_v27 = vpop.eup %1497 }
 0x52a   : > { %v1223_v22 = vmul.f32 %v1498_v27, %v1221_v23  ;;  %1501 = vrcp.f32 %v1240_v12  ;;  %vm1228_vm9 = vweird.f32 %v1498_v27  ;;  %v1252_v32 = vand.u32 2147483648, %v1240_v12 }
 0x52b   : > { %v1500_v28 = vpop.eup %1499  ;;  %vm1229_vm11 = vmor %vm1227_vm10, %vm1228_vm9  ;;  %1503 = vtanh.f32 %v1216_v6  ;;  %v1250_v8 = vand.u32 2147483647, %v1240_v12  ;;  %vm1246_vm13 = vweird.f32 %v1240_v12  ;;  %vm1266_vm9 = vweird.f32 %v1260_v2 }
 0x52c   : > { %v1224_v55 = vsub.f32 1.0, %v1223_v22  ;;  %v1262_v20 = vmul.f32 %v1500_v28, %v1260_v2  ;;  %v1253_v0 = vor.u32 1.1754944e-38, %v1252_v32  ;;  %vm1267_vm8 = vweird.f32 %v1500_v28 }
 0x52d   : > { %vm1251_vm0 = vcmp.eq.f32.partialorder %v1250_v8, 8.507059e+37  ;;  %vm1268_vm10 = vmor %vm1266_vm9, %vm1267_vm8 }
 0x52e   : > { %v1225_v5 = vmul.f32 %v1498_v27, %v1224_v55  ;;  %v1263_v7 = vsub.f32 1.0, %v1262_v20 }
 0x530   : > { %v1502_v26 = vpop.eup %1501  ;;  %v1226_v19 = vadd.f32 %v1498_v27, %v1225_v5  ;;  %v1264_v23 = vmul.f32 %v1500_v28, %v1263_v7 }
 0x531   : > { %v1242_v14 = vmul.f32 %v1502_v26, %v1240_v12  ;;  %vm1247_vm12 = vweird.f32 %v1502_v26  ;;  %v1504_v30 = vpop.eup %1503  ;;  %v1270_v12 = vand.u32 2147483647, %v1260_v2 }
 0x532   : > { %v1230_v24 = vsel %vm1229_vm11, %v1498_v27, %v1226_v19  ;;  %vm1248_vm15 = vmor %vm1246_vm13, %vm1247_vm12  ;;  %v1265_v22 = vadd.f32 %v1500_v28, %v1264_v23  ;;  %v1272_v27 = vand.u32 2147483648, %v1260_v2  ;;  %v1323_v17 = vpop.f32.mrf.mxu2 }
 0x533   : > { %v1243_v10 = vsub.f32 1.0, %v1242_v14  ;;  %v1235_v15 = vsel %vm1232_vm14, %v1234_v3, %v1230_v24  ;;  %vm1271_vm11 = vcmp.eq.f32.partialorder %v1270_v12, 8.507059e+37 }
 0x534   : > { %v1277_v31 = vmul.f32 %v1504_v30, %v1235_v15  ;;  %v1269_v55 = vsel %vm1268_vm10, %v1500_v28, %v1265_v22  ;;  %v1273_v25 = vor.u32 1.1754944e-38, %v1272_v27  ;;  %v1332_v28 = vperm.slane %v3239_v42, 0 }
 0x535   : > { %v1244_v29 = vmul.f32 %v1502_v26, %v1243_v10  ;;  %v1328_v10 = vperm.slane %v4207_v16, 0 }
 0x536   : > { %v1274_v5 = vsel %vm1271_vm11, %v1273_v25, %v1269_v55 }
 0x537   : > { %v1245_v13 = vadd.f32 %v1502_v26, %v1244_v29 }
 0x539   : > { %v1249_v9 = vsel %vm1248_vm15, %v1502_v26, %v1245_v13  ;;  %v4206_v26 = vld [vmem:[#allocation223_spill] sm:$0xff] }
 0x53a   : > { %v1254_v21 = vsel %vm1251_vm0, %v1253_v0, %v1249_v9  ;;  %v1303_v6 = vperm.slane %v4206_v26, 0 }
 0x53b   : > { %v1276_v11 = vmul.f32 %v1521_v63, %v1254_v21 }
 0x53d   : > { %v1278_v63 = vadd.f32 %v1277_v31, %v1276_v11  }
 0x53f   : > { %1505 = vtanh.f32 %v1278_v63 }
 0x545   : > { %v1506_v1 = vpop.eup %1505 }
 0x546   : > { %v1280_v55 = vmul.f32 %v1506_v1, %v1274_v5  }
 0x548   : > { %1297 = vmatmul.f32.vlgmr.msrb.gmra.mxu1 %v1280_v55 }
 0x5c5   : > { %v1298_v14 = vpop.f32.mrf.mxu1 }
 0x5c6   : > { %v1301_v19 = vadd.f32 %v1298_v14, %v3461_v4 }
 0x5c8   : > { %v1305_v20 = vadd.f32 %v1303_v6, %v1301_v19 }
 0x5ca   : > { %v1326_v32 = vadd.f32 %v1323_v17, %v1305_v20 }
 0x5cc   : > { %v1330_v2 = vadd.f32 %v1328_v10, %v1326_v32 }
 0x5ce   : > { %1350 = vmatmul.f32.vlgmr.msrb.gmra.mxu3 %v1330_v2 }
 0x650   :  { %587 = sbr.rel (!%p585_p0) target bundleno = 278 (0x116), region = 126 }
 0x651   : > { %v1351_v29 = vpop.f32.mrf.mxu3 }
 0x652   : > { %v1352_v24 = vadd.f32 %v1351_v29, %v1332_v28 }
 0x654   : > { %1355 = vst [vmem:[%s1354_s29] sm:$0xff] %v1352_v24 }

</bundles_post_ra>
